<compile_context>
chip_gen: v5e
topology: v5e:2x2
jax: 0.10.0
libtpu: 0.0.40
codegen_flags: <defaults>
</compile_context>

<pallas_src>
import math

import jax
import jax.numpy as jnp
from jax.experimental import pallas as pl
from jax.experimental.pallas import tpu as pltpu

# ----------------------------- config -----------------------------
B = 2           # batch
S = 8           # sequence length
H = 32          # hidden size
NH = 4          # num attention heads
DH = H // NH    # head dim
I = 64          # intermediate size
BS = B * S      # flattened row count
HP = 128        # lane-padded hidden / intermediate width (one full lane tile)
LN_EPS = 1e-5   # PyTorch nn.LayerNorm default
MASK_NEG = -10000.0

assert H <= HP and I <= HP and 3 * H <= 3 * HP


def _gelu_exact(x):
    # nn.GELU() default: exact erf formulation
    return 0.5 * x * (1.0 + jax.lax.erf(x * (1.0 / math.sqrt(2.0))))


def _layer_norm_padded(x, gamma, beta, valid):
    """LayerNorm over the H real lanes of a (rows, HP) array whose padded lanes
    (>= H) are exactly zero. gamma/beta are zero-padded, so padded output lanes
    stay exactly zero (required for the next stage's lane sums)."""
    mean = jnp.sum(x, axis=-1, keepdims=True) * (1.0 / H)
    xc = (x - mean) * valid
    var = jnp.sum(xc * xc, axis=-1, keepdims=True) * (1.0 / H)
    return xc * jax.lax.rsqrt(var + LN_EPS) * gamma + beta


# ----------------------------- kernel -----------------------------
def transformer_layer_kernel(x_ref, bias_ref, w_ref, vec_ref, o_ref):
    x = x_ref[...]                         # (BS, HP) f32; lanes >= H are exactly 0
    bias = bias_ref[...]                   # (BS, BS) additive mask bias (block-diag)

    # --- unpack packed slabs (all slices sublane/lane tile-aligned) ---
    wqkv = w_ref[0:HP, :]                  # (HP, 3*HP): [Wq*1/sqrt(DH) | Wk | Wv], zero-padded
    wo = w_ref[HP:2 * HP, 0:HP]            # (HP, HP)
    w1 = w_ref[HP:2 * HP, HP:2 * HP]       # (HP, HP)
    w2 = w_ref[HP:2 * HP, 2 * HP:3 * HP]   # (HP, HP)

    bqkv = vec_ref[0:1, :]                 # (1, 3*HP)
    bo = vec_ref[1:2, 0:HP]
    b1 = vec_ref[2:3, 0:HP]
    b2 = vec_ref[3:4, 0:HP]
    g1 = vec_ref[4:5, 0:HP]
    be1 = vec_ref[5:6, 0:HP]
    g2 = vec_ref[6:7, 0:HP]
    be2 = vec_ref[7:8, 0:HP]

    # ---------------- fused QKV projection (single MXU push) ----------------
    qkv = jnp.dot(x, wqkv, preferred_element_type=jnp.float32) + bqkv   # (BS, 3*HP)
    q = qkv[:, 0:HP]                       # 128-lane tile-aligned splits (no rotates)
    k = qkv[:, HP:2 * HP]
    v = qkv[:, 2 * HP:3 * HP]

    # ---------------- multi-head self-attention ----------------
    # Heads selected with lane masks (VPU selects) instead of DH=8 lane-offset
    # slices; per-head contexts land in disjoint lane ranges of `ctx`, so W_o
    # is applied with ONE matmul after the loop.
    col = jax.lax.broadcasted_iota(jnp.int32, (1, HP), 1)
    dims = (((1,), (1,)), ((), ()))        # q @ k^T without materializing transpose
    ctx = jnp.zeros((BS, HP), jnp.float32)
    for h in range(NH):                    # static unroll over heads
        hm = ((col >= h * DH) & (col < (h + 1) * DH)).astype(jnp.float32)  # (1, HP)
        s = jax.lax.dot_general(q * hm, k, dims,
                                preferred_element_type=jnp.float32) + bias  # (BS, BS)
        s = s - jnp.max(s, axis=-1, keepdims=True)
        e = jnp.exp(s)
        p = e / jnp.sum(e, axis=-1, keepdims=True)     # exact softmax divide
        ctx = ctx + jnp.dot(p, v, preferred_element_type=jnp.float32) * hm
    attn = jnp.dot(ctx, wo, preferred_element_type=jnp.float32) + bo
    # attention-probs dropout / attention-output dropout: identity in eval mode

    valid = (col < H).astype(jnp.float32)              # real-hidden lane mask
    x1 = _layer_norm_padded(x + attn, g1, be1, valid)

    # ------------------------- feed-forward -------------------------
    inter = _gelu_exact(jnp.dot(x1, w1, preferred_element_type=jnp.float32) + b1)
    ffn = jnp.dot(inter, w2, preferred_element_type=jnp.float32) + b2
    # output dropout: identity in eval mode
    y = _layer_norm_padded(x1 + ffn, g2, be2, valid)

    o_ref[...] = y.astype(o_ref.dtype)                 # lane-dense (BS, 128) store


# ------------------- one-time host-side packing (hoisted) -------------------
def pack_params(params):
    """Fold the 1/sqrt(DH) score scale into Q, fuse QKV, zero-pad everything to
    128 lanes and pack into two slabs (one weight DMA, one vector DMA)."""
    inv_sqrt_dh = 1.0 / math.sqrt(float(DH))

    def pad_w(w):
        w = jnp.asarray(w, jnp.float32)
        return jnp.zeros((HP, HP), jnp.float32).at[: w.shape[0], : w.shape[1]].set(w)

    w_slab = jnp.concatenate([
        jnp.concatenate([pad_w(params["wq"] * inv_sqrt_dh),
                         pad_w(params["wk"]),
                         pad_w(params["wv"])], axis=1),          # (HP, 3*HP)
        jnp.concatenate([pad_w(params["wo"]),
                         pad_w(params["w1"]),
                         pad_w(params["w2"])], axis=1),          # (HP, 3*HP)
    ], axis=0)                                                   # (2*HP, 3*HP)

    def pad_row(vec, width):
        vec = jnp.asarray(vec, jnp.float32).reshape(-1)
        return jnp.zeros((1, width), jnp.float32).at[0, : vec.shape[0]].set(vec)

    bqkv = jnp.concatenate([pad_row(params["bq"] * inv_sqrt_dh, HP),
                            pad_row(params["bk"], HP),
                            pad_row(params["bv"], HP)], axis=1)  # (1, 3*HP)

    vec_slab = jnp.concatenate([
        bqkv,
        pad_row(params["bo"], 3 * HP),
        pad_row(params["b1"], 3 * HP),
        pad_row(params["b2"], 3 * HP),
        pad_row(params["ln1_g"], 3 * HP),
        pad_row(params["ln1_b"], 3 * HP),
        pad_row(params["ln2_g"], 3 * HP),
        pad_row(params["ln2_b"], 3 * HP),
    ], axis=0)                                                   # (8, 3*HP)
    return w_slab, vec_slab


def pack_attention_bias(attention_mask):
    """Block-diagonal additive mask bias over flattened rows. Within-batch
    blocks come from (1-mask)*-1e4; cross-batch blocks are fully masked, whose
    exp underflows to exactly 0 after row-max subtraction -> identical to a
    per-batch softmax (as long as no row is fully masked, same as reference)."""
    blk = (1.0 - attention_mask.astype(jnp.float32)) * MASK_NEG  # (B, S, S)
    eye = jnp.eye(B, dtype=jnp.float32)                          # (B, B)
    bias4 = (eye[:, None, :, None] * blk[:, :, None, :]
             + (1.0 - eye)[:, None, :, None] * MASK_NEG)         # (B, S, B, S)
    return bias4.reshape(BS, BS)


# ----------------------------- per-call wrapper -----------------------------
def _transformer_layer(x, bias, w_slab, vec_slab):
    """x: (B, S, H) f32; bias/slabs from pack_attention_bias / pack_params."""
    x_p = jnp.zeros((BS, HP), jnp.float32).at[:, :H].set(x.reshape(BS, H))

    out = pl.pallas_call(
        transformer_layer_kernel,
        out_shape=jax.ShapeDtypeStruct((BS, HP), jnp.float32),
        grid=(1,),                                    # whole problem in one step
        in_specs=[
            pl.BlockSpec((BS, HP), lambda i: (0, 0)),            # x (padded)
            pl.BlockSpec((BS, BS), lambda i: (0, 0)),            # mask bias
            pl.BlockSpec((2 * HP, 3 * HP), lambda i: (0, 0)),    # weight slab
            pl.BlockSpec((8, 3 * HP), lambda i: (0, 0)),         # vector slab
        ],
        out_specs=pl.BlockSpec((BS, HP), lambda i: (0, 0)),
        compiler_params=pltpu.CompilerParams(
            # NOTE: at realistic B*S, split rows over a "parallel" grid axis so
            # v7x's second TensorCore is used and a flash-style key loop avoids
            # the dense (BS,BS) bias; pointless at B*S=16.
            dimension_semantics=("arbitrary",),
        ),
    )(x_p, bias, w_slab, vec_slab)
    return out[:, :H].reshape(x.shape)


transformer_layer = jax.jit(_transformer_layer)


# ----------------------------- params & reference -----------------------------
def init_params(key):
    """Deterministic synthetic parameters. Linear weights stored as (in, out)."""
    keys = jax.random.split(key, 8)
    scale = 0.02
    return {
        "wq": jax.random.normal(keys[0], (H, H), jnp.float32) * scale,
        "wk": jax.random.normal(keys[1], (H, H), jnp.float32) * scale,
        "wv": jax.random.normal(keys[2], (H, H), jnp.float32) * scale,
        "wo": jax.random.normal(keys[3], (H, H), jnp.float32) * scale,
        "w1": jax.random.normal(keys[4], (H, I), jnp.float32) * scale,
        "w2": jax.random.normal(keys[5], (I, H), jnp.float32) * scale,
        "bq": jnp.zeros((1, H), jnp.float32),
        "bk": jnp.zeros((1, H), jnp.float32) + 0.01,
        "bv": jnp.zeros((1, H), jnp.float32) - 0.01,
        "bo": jnp.zeros((1, H), jnp.float32),
        "b1": jnp.zeros((1, I), jnp.float32) + 0.005,
        "b2": jnp.zeros((1, H), jnp.float32),
        "ln1_g": jnp.ones((1, H), jnp.float32),
        "ln1_b": jnp.zeros((1, H), jnp.float32),
        "ln2_g": jnp.ones((1, H), jnp.float32),
        "ln2_b": jnp.zeros((1, H), jnp.float32),
    }


def _layer_norm_ref(x, gamma, beta):
    mean = jnp.mean(x, axis=-1, keepdims=True)
    var = jnp.mean((x - mean) ** 2, axis=-1, keepdims=True)
    return (x - mean) * jax.lax.rsqrt(var + LN_EPS) * gamma + beta


def _reference(x, attention_mask, params):
    """Pure-JAX mirror of the PyTorch forward (eval mode)."""
    q = x @ params["wq"] + params["bq"]
    k = x @ params["wk"] + params["bk"]
    v = x @ params["wv"] + params["bv"]
    split = lambda t: t.reshape(B, S, NH, DH).transpose(0, 2, 1, 3)
    qh, kh, vh = split(q), split(k), split(v)
    scores = jnp.einsum("bhqd,bhkd->bhqk", qh, kh) / math.sqrt(float(DH))
    scores = scores + (1.0 - attention_mask[:, None, :, :]) * MASK_NEG
    probs = jax.nn.softmax(scores, axis=-1)
    ctx = jnp.einsum("bhqk,bhkd->bhqd", probs, vh)
    ctx = ctx.transpose(0, 2, 1, 3).reshape(B, S, H)
    attn = ctx @ params["wo"] + params["bo"]
    x1 = _layer_norm_ref(x + attn, params["ln1_g"], params["ln1_b"])
    inter = _gelu_exact(x1 @ params["w1"] + params["b1"])
    ffn = inter @ params["w2"] + params["b2"]
    return _layer_norm_ref(x1 + ffn, params["ln2_g"], params["ln2_b"])


if __name__ == "__main__":
    key = jax.random.PRNGKey(0)
    k_x, k_p = jax.random.split(key)

    x = jax.random.normal(k_x, (B, S, H), jnp.float32)
    # 3-D attention mask (1 = attend). Mask out the last 2 key positions of batch 1.
    attention_mask = jnp.ones((B, S, S), jnp.float32)
    attention_mask = attention_mask.at[1, :, -2:].set(0.0)

    params = init_params(k_p)

    # One-time packing (hoisted off the per-call path).
    w_slab, vec_slab = pack_params(params)
    bias = pack_attention_bias(attention_mask)
    w_slab, vec_slab, bias = jax.block_until_ready((w_slab, vec_slab, bias))

    out = transformer_layer(x, bias, w_slab, vec_slab)
    out = jax.block_until_ready(out)

    ref = _reference(x, attention_mask, params)

    assert out.shape == (B, S, H)
    assert bool(jnp.all(jnp.isfinite(out)))
    assert bool(jnp.allclose(out, ref, atol=1e-2, rtol=1e-2))
    print("KERNEL_OK")
</pallas_src>

<mosaic_0001>
module attributes {stable_mosaic.version = 11 : i64} {
  func.func @transformer_layer_kernel(%arg0: i32, %arg1: memref<16x128xf32, #tpu.memory_space<vmem>>, %arg2: memref<16x16xf32, #tpu.memory_space<vmem>>, %arg3: memref<256x384xf32, #tpu.memory_space<vmem>>, %arg4: memref<8x384xf32, #tpu.memory_space<vmem>>, %arg5: memref<16x128xf32, #tpu.memory_space<vmem>>) attributes {dimension_semantics = [#tpu.dimension_semantics<arbitrary>], iteration_bounds = array<i64: 1>, scalar_prefetch = 0 : i64, scratch_operands = 0 : i64, tpu.core_type = #tpu.core_type<tc>, window_params = [{pipeline_mode = #tpu.pipeline_mode<synchronous>, transform_indices = @transform_0, window_bounds = array<i64: 16, 128>}, {pipeline_mode = #tpu.pipeline_mode<synchronous>, transform_indices = @transform_1, window_bounds = array<i64: 16, 16>}, {pipeline_mode = #tpu.pipeline_mode<synchronous>, transform_indices = @transform_2, window_bounds = array<i64: 256, 384>}, {pipeline_mode = #tpu.pipeline_mode<synchronous>, transform_indices = @transform_3, window_bounds = array<i64: 8, 384>}, {pipeline_mode = #tpu.pipeline_mode<synchronous>, transform_indices = @transform_4, window_bounds = array<i64: 16, 128>}]} {
    %c0 = arith.constant 0 : index
    %c0_0 = arith.constant 0 : index
    %0 = vector.load %arg1[%c0, %c0_0] : memref<16x128xf32, #tpu.memory_space<vmem>>, vector<16x128xf32>
    %c0_1 = arith.constant 0 : index
    %c0_2 = arith.constant 0 : index
    %1 = vector.load %arg2[%c0_1, %c0_2] : memref<16x16xf32, #tpu.memory_space<vmem>>, vector<16x16xf32>
    %c0_3 = arith.constant 0 : index
    %c0_4 = arith.constant 0 : index
    %2 = vector.load %arg3[%c0_3, %c0_4] : memref<256x384xf32, #tpu.memory_space<vmem>>, vector<128x384xf32>
    %c128 = arith.constant 128 : index
    %c0_5 = arith.constant 0 : index
    %3 = vector.load %arg3[%c128, %c0_5] : memref<256x384xf32, #tpu.memory_space<vmem>>, vector<128x128xf32>
    %c128_6 = arith.constant 128 : index
    %c128_7 = arith.constant 128 : index
    %4 = vector.load %arg3[%c128_6, %c128_7] : memref<256x384xf32, #tpu.memory_space<vmem>>, vector<128x128xf32>
    %c128_8 = arith.constant 128 : index
    %c256 = arith.constant 256 : index
    %5 = vector.load %arg3[%c128_8, %c256] : memref<256x384xf32, #tpu.memory_space<vmem>>, vector<128x128xf32>
    %c0_9 = arith.constant 0 : index
    %c0_10 = arith.constant 0 : index
    %6 = vector.load %arg4[%c0_9, %c0_10] : memref<8x384xf32, #tpu.memory_space<vmem>>, vector<1x384xf32>
    %c1 = arith.constant 1 : index
    %c0_11 = arith.constant 0 : index
    %7 = vector.load %arg4[%c1, %c0_11] : memref<8x384xf32, #tpu.memory_space<vmem>>, vector<1x128xf32>
    %c2 = arith.constant 2 : index
    %c0_12 = arith.constant 0 : index
    %8 = vector.load %arg4[%c2, %c0_12] : memref<8x384xf32, #tpu.memory_space<vmem>>, vector<1x128xf32>
    %c3 = arith.constant 3 : index
    %c0_13 = arith.constant 0 : index
    %9 = vector.load %arg4[%c3, %c0_13] : memref<8x384xf32, #tpu.memory_space<vmem>>, vector<1x128xf32>
    %c4 = arith.constant 4 : index
    %c0_14 = arith.constant 0 : index
    %10 = vector.load %arg4[%c4, %c0_14] : memref<8x384xf32, #tpu.memory_space<vmem>>, vector<1x128xf32>
    %c5 = arith.constant 5 : index
    %c0_15 = arith.constant 0 : index
    %11 = vector.load %arg4[%c5, %c0_15] : memref<8x384xf32, #tpu.memory_space<vmem>>, vector<1x128xf32>
    %c6 = arith.constant 6 : index
    %c0_16 = arith.constant 0 : index
    %12 = vector.load %arg4[%c6, %c0_16] : memref<8x384xf32, #tpu.memory_space<vmem>>, vector<1x128xf32>
    %c7 = arith.constant 7 : index
    %c0_17 = arith.constant 0 : index
    %13 = vector.load %arg4[%c7, %c0_17] : memref<8x384xf32, #tpu.memory_space<vmem>>, vector<1x128xf32>
    %cst = arith.constant dense<0.000000e+00> : vector<16x384xf32>
    %14 = tpu.matmul %0, %2, %cst {dimension_numbers = #tpu.dot_dimension_numbers<[1], [0], [0], [1], [0, 0, 1, 1], [], []>} : vector<16x128xf32>, vector<128x384xf32>, vector<16x384xf32> -> vector<16x384xf32>
    %15 = vector.broadcast %6 : vector<1x384xf32> to vector<16x384xf32>
    %16 = arith.addf %14, %15 : vector<16x384xf32>
    %17 = vector.extract_strided_slice %16 {offsets = [0, 0], sizes = [16, 128], strides = [1, 1]} : vector<16x384xf32> to vector<16x128xf32>
    %18 = vector.extract_strided_slice %16 {offsets = [0, 128], sizes = [16, 128], strides = [1, 1]} : vector<16x384xf32> to vector<16x128xf32>
    %19 = vector.extract_strided_slice %16 {offsets = [0, 256], sizes = [16, 128], strides = [1, 1]} : vector<16x384xf32> to vector<16x128xf32>
    %20 = tpu.iota {dimensions = array<i32: 1>} : vector<1x128xi32>
    %cst_18 = arith.constant 0.000000e+00 : f32
    %21 = vector.broadcast %cst_18 : f32 to vector<16x128xf32>
    %c0_i32 = arith.constant 0 : i32
    %22 = vector.broadcast %c0_i32 : i32 to vector<1x128xi32>
    %23 = arith.cmpi sge, %20, %22 : vector<1x128xi32>
    %c8_i32 = arith.constant 8 : i32
    %24 = vector.broadcast %c8_i32 : i32 to vector<1x128xi32>
    %25 = arith.cmpi slt, %20, %24 : vector<1x128xi32>
    %26 = arith.andi %23, %25 : vector<1x128xi1>
    %27 = arith.extui %26 : vector<1x128xi1> to vector<1x128xi32>
    %28 = arith.sitofp %27 : vector<1x128xi32> to vector<1x128xf32>
    %29 = vector.broadcast %28 : vector<1x128xf32> to vector<16x128xf32>
    %30 = arith.mulf %17, %29 : vector<16x128xf32>
    %cst_19 = arith.constant dense<0.000000e+00> : vector<16x16xf32>
    %31 = tpu.matmul %30, %18, %cst_19 {dimension_numbers = #tpu.dot_dimension_numbers<[1], [1], [0], [0], [0, 0, 1, 0], [], []>} : vector<16x128xf32>, vector<16x128xf32>, vector<16x16xf32> -> vector<16x16xf32>
    %32 = arith.addf %31, %1 : vector<16x16xf32>
    %cst_20 = arith.constant dense<0xFF800000> : vector<16xf32>
    %33 = vector.multi_reduction <maximumf>, %32, %cst_20 [1] : vector<16x16xf32> to vector<16xf32>
    %34 = vector.shape_cast %33 : vector<16xf32> to vector<16x1xf32>
    %35 = vector.broadcast %34 : vector<16x1xf32> to vector<16x16xf32>
    %36 = arith.subf %32, %35 : vector<16x16xf32>
    %37 = math.exp %36 : vector<16x16xf32>
    %cst_21 = arith.constant dense<0.000000e+00> : vector<16xf32>
    %38 = vector.multi_reduction <add>, %37, %cst_21 [1] : vector<16x16xf32> to vector<16xf32>
    %39 = vector.shape_cast %38 : vector<16xf32> to vector<16x1xf32>
    %40 = vector.broadcast %39 : vector<16x1xf32> to vector<16x16xf32>
    %41 = arith.divf %37, %40 : vector<16x16xf32>
    %cst_22 = arith.constant dense<0.000000e+00> : vector<16x128xf32>
    %42 = tpu.matmul %41, %19, %cst_22 {dimension_numbers = #tpu.dot_dimension_numbers<[1], [0], [0], [1], [0, 0, 1, 1], [], []>} : vector<16x16xf32>, vector<16x128xf32>, vector<16x128xf32> -> vector<16x128xf32>
    %43 = vector.broadcast %28 : vector<1x128xf32> to vector<16x128xf32>
    %44 = arith.mulf %42, %43 : vector<16x128xf32>
    %45 = arith.addf %21, %44 : vector<16x128xf32>
    %c8_i32_23 = arith.constant 8 : i32
    %46 = vector.broadcast %c8_i32_23 : i32 to vector<1x128xi32>
    %47 = arith.cmpi sge, %20, %46 : vector<1x128xi32>
    %c16_i32 = arith.constant 16 : i32
    %48 = vector.broadcast %c16_i32 : i32 to vector<1x128xi32>
    %49 = arith.cmpi slt, %20, %48 : vector<1x128xi32>
    %50 = arith.andi %47, %49 : vector<1x128xi1>
    %51 = arith.extui %50 : vector<1x128xi1> to vector<1x128xi32>
    %52 = arith.sitofp %51 : vector<1x128xi32> to vector<1x128xf32>
    %53 = vector.broadcast %52 : vector<1x128xf32> to vector<16x128xf32>
    %54 = arith.mulf %17, %53 : vector<16x128xf32>
    %cst_24 = arith.constant dense<0.000000e+00> : vector<16x16xf32>
    %55 = tpu.matmul %54, %18, %cst_24 {dimension_numbers = #tpu.dot_dimension_numbers<[1], [1], [0], [0], [0, 0, 1, 0], [], []>} : vector<16x128xf32>, vector<16x128xf32>, vector<16x16xf32> -> vector<16x16xf32>
    %56 = arith.addf %55, %1 : vector<16x16xf32>
    %cst_25 = arith.constant dense<0xFF800000> : vector<16xf32>
    %57 = vector.multi_reduction <maximumf>, %56, %cst_25 [1] : vector<16x16xf32> to vector<16xf32>
    %58 = vector.shape_cast %57 : vector<16xf32> to vector<16x1xf32>
    %59 = vector.broadcast %58 : vector<16x1xf32> to vector<16x16xf32>
    %60 = arith.subf %56, %59 : vector<16x16xf32>
    %61 = math.exp %60 : vector<16x16xf32>
    %cst_26 = arith.constant dense<0.000000e+00> : vector<16xf32>
    %62 = vector.multi_reduction <add>, %61, %cst_26 [1] : vector<16x16xf32> to vector<16xf32>
    %63 = vector.shape_cast %62 : vector<16xf32> to vector<16x1xf32>
    %64 = vector.broadcast %63 : vector<16x1xf32> to vector<16x16xf32>
    %65 = arith.divf %61, %64 : vector<16x16xf32>
    %cst_27 = arith.constant dense<0.000000e+00> : vector<16x128xf32>
    %66 = tpu.matmul %65, %19, %cst_27 {dimension_numbers = #tpu.dot_dimension_numbers<[1], [0], [0], [1], [0, 0, 1, 1], [], []>} : vector<16x16xf32>, vector<16x128xf32>, vector<16x128xf32> -> vector<16x128xf32>
    %67 = vector.broadcast %52 : vector<1x128xf32> to vector<16x128xf32>
    %68 = arith.mulf %66, %67 : vector<16x128xf32>
    %69 = arith.addf %45, %68 : vector<16x128xf32>
    %c16_i32_28 = arith.constant 16 : i32
    %70 = vector.broadcast %c16_i32_28 : i32 to vector<1x128xi32>
    %71 = arith.cmpi sge, %20, %70 : vector<1x128xi32>
    %c24_i32 = arith.constant 24 : i32
    %72 = vector.broadcast %c24_i32 : i32 to vector<1x128xi32>
    %73 = arith.cmpi slt, %20, %72 : vector<1x128xi32>
    %74 = arith.andi %71, %73 : vector<1x128xi1>
    %75 = arith.extui %74 : vector<1x128xi1> to vector<1x128xi32>
    %76 = arith.sitofp %75 : vector<1x128xi32> to vector<1x128xf32>
    %77 = vector.broadcast %76 : vector<1x128xf32> to vector<16x128xf32>
    %78 = arith.mulf %17, %77 : vector<16x128xf32>
    %cst_29 = arith.constant dense<0.000000e+00> : vector<16x16xf32>
    %79 = tpu.matmul %78, %18, %cst_29 {dimension_numbers = #tpu.dot_dimension_numbers<[1], [1], [0], [0], [0, 0, 1, 0], [], []>} : vector<16x128xf32>, vector<16x128xf32>, vector<16x16xf32> -> vector<16x16xf32>
    %80 = arith.addf %79, %1 : vector<16x16xf32>
    %cst_30 = arith.constant dense<0xFF800000> : vector<16xf32>
    %81 = vector.multi_reduction <maximumf>, %80, %cst_30 [1] : vector<16x16xf32> to vector<16xf32>
    %82 = vector.shape_cast %81 : vector<16xf32> to vector<16x1xf32>
    %83 = vector.broadcast %82 : vector<16x1xf32> to vector<16x16xf32>
    %84 = arith.subf %80, %83 : vector<16x16xf32>
    %85 = math.exp %84 : vector<16x16xf32>
    %cst_31 = arith.constant dense<0.000000e+00> : vector<16xf32>
    %86 = vector.multi_reduction <add>, %85, %cst_31 [1] : vector<16x16xf32> to vector<16xf32>
    %87 = vector.shape_cast %86 : vector<16xf32> to vector<16x1xf32>
    %88 = vector.broadcast %87 : vector<16x1xf32> to vector<16x16xf32>
    %89 = arith.divf %85, %88 : vector<16x16xf32>
    %cst_32 = arith.constant dense<0.000000e+00> : vector<16x128xf32>
    %90 = tpu.matmul %89, %19, %cst_32 {dimension_numbers = #tpu.dot_dimension_numbers<[1], [0], [0], [1], [0, 0, 1, 1], [], []>} : vector<16x16xf32>, vector<16x128xf32>, vector<16x128xf32> -> vector<16x128xf32>
    %91 = vector.broadcast %76 : vector<1x128xf32> to vector<16x128xf32>
    %92 = arith.mulf %90, %91 : vector<16x128xf32>
    %93 = arith.addf %69, %92 : vector<16x128xf32>
    %c24_i32_33 = arith.constant 24 : i32
    %94 = vector.broadcast %c24_i32_33 : i32 to vector<1x128xi32>
    %95 = arith.cmpi sge, %20, %94 : vector<1x128xi32>
    %c32_i32 = arith.constant 32 : i32
    %96 = vector.broadcast %c32_i32 : i32 to vector<1x128xi32>
    %97 = arith.cmpi slt, %20, %96 : vector<1x128xi32>
    %98 = arith.andi %95, %97 : vector<1x128xi1>
    %99 = arith.extui %98 : vector<1x128xi1> to vector<1x128xi32>
    %100 = arith.sitofp %99 : vector<1x128xi32> to vector<1x128xf32>
    %101 = vector.broadcast %100 : vector<1x128xf32> to vector<16x128xf32>
    %102 = arith.mulf %17, %101 : vector<16x128xf32>
    %cst_34 = arith.constant dense<0.000000e+00> : vector<16x16xf32>
    %103 = tpu.matmul %102, %18, %cst_34 {dimension_numbers = #tpu.dot_dimension_numbers<[1], [1], [0], [0], [0, 0, 1, 0], [], []>} : vector<16x128xf32>, vector<16x128xf32>, vector<16x16xf32> -> vector<16x16xf32>
    %104 = arith.addf %103, %1 : vector<16x16xf32>
    %cst_35 = arith.constant dense<0xFF800000> : vector<16xf32>
    %105 = vector.multi_reduction <maximumf>, %104, %cst_35 [1] : vector<16x16xf32> to vector<16xf32>
    %106 = vector.shape_cast %105 : vector<16xf32> to vector<16x1xf32>
    %107 = vector.broadcast %106 : vector<16x1xf32> to vector<16x16xf32>
    %108 = arith.subf %104, %107 : vector<16x16xf32>
    %109 = math.exp %108 : vector<16x16xf32>
    %cst_36 = arith.constant dense<0.000000e+00> : vector<16xf32>
    %110 = vector.multi_reduction <add>, %109, %cst_36 [1] : vector<16x16xf32> to vector<16xf32>
    %111 = vector.shape_cast %110 : vector<16xf32> to vector<16x1xf32>
    %112 = vector.broadcast %111 : vector<16x1xf32> to vector<16x16xf32>
    %113 = arith.divf %109, %112 : vector<16x16xf32>
    %cst_37 = arith.constant dense<0.000000e+00> : vector<16x128xf32>
    %114 = tpu.matmul %113, %19, %cst_37 {dimension_numbers = #tpu.dot_dimension_numbers<[1], [0], [0], [1], [0, 0, 1, 1], [], []>} : vector<16x16xf32>, vector<16x128xf32>, vector<16x128xf32> -> vector<16x128xf32>
    %115 = vector.broadcast %100 : vector<1x128xf32> to vector<16x128xf32>
    %116 = arith.mulf %114, %115 : vector<16x128xf32>
    %117 = arith.addf %93, %116 : vector<16x128xf32>
    %cst_38 = arith.constant dense<0.000000e+00> : vector<16x128xf32>
    %118 = tpu.matmul %117, %3, %cst_38 {dimension_numbers = #tpu.dot_dimension_numbers<[1], [0], [0], [1], [0, 0, 1, 1], [], []>} : vector<16x128xf32>, vector<128x128xf32>, vector<16x128xf32> -> vector<16x128xf32>
    %119 = vector.broadcast %7 : vector<1x128xf32> to vector<16x128xf32>
    %120 = arith.addf %118, %119 : vector<16x128xf32>
    %c32_i32_39 = arith.constant 32 : i32
    %121 = vector.broadcast %c32_i32_39 : i32 to vector<1x128xi32>
    %122 = arith.cmpi slt, %20, %121 : vector<1x128xi32>
    %123 = arith.extui %122 : vector<1x128xi1> to vector<1x128xi32>
    %124 = arith.sitofp %123 : vector<1x128xi32> to vector<1x128xf32>
    %125 = arith.addf %0, %120 : vector<16x128xf32>
    %cst_40 = arith.constant dense<0.000000e+00> : vector<16xf32>
    %126 = vector.multi_reduction <add>, %125, %cst_40 [1] : vector<16x128xf32> to vector<16xf32>
    %127 = vector.shape_cast %126 : vector<16xf32> to vector<16x1xf32>
    %cst_41 = arith.constant 3.125000e-02 : f32
    %128 = vector.broadcast %cst_41 : f32 to vector<16x1xf32>
    %129 = arith.mulf %127, %128 : vector<16x1xf32>
    %130 = vector.broadcast %129 : vector<16x1xf32> to vector<16x128xf32>
    %131 = arith.subf %125, %130 : vector<16x128xf32>
    %132 = vector.broadcast %124 : vector<1x128xf32> to vector<16x128xf32>
    %133 = arith.mulf %131, %132 : vector<16x128xf32>
    %134 = arith.mulf %133, %133 : vector<16x128xf32>
    %cst_42 = arith.constant dense<0.000000e+00> : vector<16xf32>
    %135 = vector.multi_reduction <add>, %134, %cst_42 [1] : vector<16x128xf32> to vector<16xf32>
    %136 = vector.shape_cast %135 : vector<16xf32> to vector<16x1xf32>
    %cst_43 = arith.constant 3.125000e-02 : f32
    %137 = vector.broadcast %cst_43 : f32 to vector<16x1xf32>
    %138 = arith.mulf %136, %137 : vector<16x1xf32>
    %cst_44 = arith.constant 9.99999974E-6 : f32
    %139 = vector.broadcast %cst_44 : f32 to vector<16x1xf32>
    %140 = arith.addf %138, %139 : vector<16x1xf32>
    %141 = math.rsqrt %140 : vector<16x1xf32>
    %142 = vector.broadcast %141 : vector<16x1xf32> to vector<16x128xf32>
    %143 = arith.mulf %133, %142 : vector<16x128xf32>
    %144 = vector.broadcast %10 : vector<1x128xf32> to vector<16x128xf32>
    %145 = arith.mulf %143, %144 : vector<16x128xf32>
    %146 = vector.broadcast %11 : vector<1x128xf32> to vector<16x128xf32>
    %147 = arith.addf %145, %146 : vector<16x128xf32>
    %cst_45 = arith.constant dense<0.000000e+00> : vector<16x128xf32>
    %148 = tpu.matmul %147, %4, %cst_45 {dimension_numbers = #tpu.dot_dimension_numbers<[1], [0], [0], [1], [0, 0, 1, 1], [], []>} : vector<16x128xf32>, vector<128x128xf32>, vector<16x128xf32> -> vector<16x128xf32>
    %149 = vector.broadcast %8 : vector<1x128xf32> to vector<16x128xf32>
    %150 = arith.addf %148, %149 : vector<16x128xf32>
    %cst_46 = arith.constant 5.000000e-01 : f32
    %151 = vector.broadcast %cst_46 : f32 to vector<16x128xf32>
    %152 = arith.mulf %151, %150 : vector<16x128xf32>
    %cst_47 = arith.constant 0.707106769 : f32
    %153 = vector.broadcast %cst_47 : f32 to vector<16x128xf32>
    %154 = arith.mulf %150, %153 : vector<16x128xf32>
    %155 = math.erf %154 : vector<16x128xf32>
    %cst_48 = arith.constant 1.000000e+00 : f32
    %156 = vector.broadcast %cst_48 : f32 to vector<16x128xf32>
    %157 = arith.addf %156, %155 : vector<16x128xf32>
    %158 = arith.mulf %152, %157 : vector<16x128xf32>
    %cst_49 = arith.constant dense<0.000000e+00> : vector<16x128xf32>
    %159 = tpu.matmul %158, %5, %cst_49 {dimension_numbers = #tpu.dot_dimension_numbers<[1], [0], [0], [1], [0, 0, 1, 1], [], []>} : vector<16x128xf32>, vector<128x128xf32>, vector<16x128xf32> -> vector<16x128xf32>
    %160 = vector.broadcast %9 : vector<1x128xf32> to vector<16x128xf32>
    %161 = arith.addf %159, %160 : vector<16x128xf32>
    %162 = arith.addf %147, %161 : vector<16x128xf32>
    %cst_50 = arith.constant dense<0.000000e+00> : vector<16xf32>
    %163 = vector.multi_reduction <add>, %162, %cst_50 [1] : vector<16x128xf32> to vector<16xf32>
    %164 = vector.shape_cast %163 : vector<16xf32> to vector<16x1xf32>
    %cst_51 = arith.constant 3.125000e-02 : f32
    %165 = vector.broadcast %cst_51 : f32 to vector<16x1xf32>
    %166 = arith.mulf %164, %165 : vector<16x1xf32>
    %167 = vector.broadcast %166 : vector<16x1xf32> to vector<16x128xf32>
    %168 = arith.subf %162, %167 : vector<16x128xf32>
    %169 = vector.broadcast %124 : vector<1x128xf32> to vector<16x128xf32>
    %170 = arith.mulf %168, %169 : vector<16x128xf32>
    %171 = arith.mulf %170, %170 : vector<16x128xf32>
    %cst_52 = arith.constant dense<0.000000e+00> : vector<16xf32>
    %172 = vector.multi_reduction <add>, %171, %cst_52 [1] : vector<16x128xf32> to vector<16xf32>
    %173 = vector.shape_cast %172 : vector<16xf32> to vector<16x1xf32>
    %cst_53 = arith.constant 3.125000e-02 : f32
    %174 = vector.broadcast %cst_53 : f32 to vector<16x1xf32>
    %175 = arith.mulf %173, %174 : vector<16x1xf32>
    %cst_54 = arith.constant 9.99999974E-6 : f32
    %176 = vector.broadcast %cst_54 : f32 to vector<16x1xf32>
    %177 = arith.addf %175, %176 : vector<16x1xf32>
    %178 = math.rsqrt %177 : vector<16x1xf32>
    %179 = vector.broadcast %178 : vector<16x1xf32> to vector<16x128xf32>
    %180 = arith.mulf %170, %179 : vector<16x128xf32>
    %181 = vector.broadcast %12 : vector<1x128xf32> to vector<16x128xf32>
    %182 = arith.mulf %180, %181 : vector<16x128xf32>
    %183 = vector.broadcast %13 : vector<1x128xf32> to vector<16x128xf32>
    %184 = arith.addf %182, %183 : vector<16x128xf32>
    %c0_55 = arith.constant 0 : index
    %c0_56 = arith.constant 0 : index
    %185 = vector.load %arg5[%c0_55, %c0_56] : memref<16x128xf32, #tpu.memory_space<vmem>>, vector<16x128xf32>
    tpu.vector_store %arg5[%c0_55, %c0_56], %184 {strides = array<i32>} : memref<16x128xf32, #tpu.memory_space<vmem>>, vector<16x128xf32>,
    return
  }
  func.func @transform_0(%arg0: i32) -> (i32, i32) {
    %c0_i32 = arith.constant 0 : i32
    %c0_i32_0 = arith.constant 0 : i32
    %c0_i32_1 = arith.constant 0 : i32
    return %c0_i32, %c0_i32_0 : i32, i32
  }
  func.func @transform_1(%arg0: i32) -> (i32, i32) {
    %c0_i32 = arith.constant 0 : i32
    %c0_i32_0 = arith.constant 0 : i32
    %c0_i32_1 = arith.constant 0 : i32
    return %c0_i32, %c0_i32_0 : i32, i32
  }
  func.func @transform_2(%arg0: i32) -> (i32, i32) {
    %c0_i32 = arith.constant 0 : i32
    %c0_i32_0 = arith.constant 0 : i32
    %c0_i32_1 = arith.constant 0 : i32
    return %c0_i32, %c0_i32_0 : i32, i32
  }
  func.func @transform_3(%arg0: i32) -> (i32, i32) {
    %c0_i32 = arith.constant 0 : i32
    %c0_i32_0 = arith.constant 0 : i32
    %c0_i32_1 = arith.constant 0 : i32
    return %c0_i32, %c0_i32_0 : i32, i32
  }
  func.func @transform_4(%arg0: i32) -> (i32, i32) {
    %c0_i32 = arith.constant 0 : i32
    %c0_i32_0 = arith.constant 0 : i32
    %c0_i32_1 = arith.constant 0 : i32
    return %c0_i32, %c0_i32_0 : i32, i32
  }
}

</mosaic_0001>

<bundles_post_ra>
// kernel: _transformer_layer.1
= control target key start
LH: loop header
LB: loop body
LE: loop exit
PB: predicated region body
PF: predicated region fallthrough
CT: control target
= control target key end

     0   :  { %9 = vsyncpa [#allocation3], 0  ;;  %s1017_s18 = smov [#allocation2]   ;;  %s1018_s20 = smov 384   ;;  %s1281_s0 = inlined_call_operand.vmem [shape: f32[16,128], index: 0, kind: input, shape index: {}]   ;;  %s1282_s1 = inlined_call_operand.vmem [shape: f32[16,16], index: 1, kind: input, shape index: {}]   ;;  %s1283_s2 = inlined_call_operand.hbm [shape: f32[256,384], index: 2, kind: input, shape index: {}]   ;;  %s1284_s3 = inlined_call_operand.vmem [shape: f32[8,384], index: 3, kind: input, shape index: {}]   ;;  %s1285_s4 = inlined_call_operand.vmem [shape: f32[16,128], index: 4, kind: output, shape index: {}]  }
   0x1   :  { %s18_s17 = sshll.u32 %s1283_s2, 4  ;;  %s20_s19 = sshll.u32 %s1017_s18, 4  ;;  %s19_s17 = int_to_ptr.hbm [resolvable:$true] %s18_s17  ;;  %s21_s19 = int_to_ptr.vmem [resolvable:$true] %s20_s19 }
   0x2   :  { %s1019_s21 = smov 24  }
   0x3   :  { %26 = dma.hbm_to_vmem [thread:$0]  %s19_s17, 12288, %s21_s19, [#allocation3], %s1018_s20, %s1018_s20, %s1019_s21  }
   0x4   :  { %1015 = dma.done.wait [#allocation3], 12288  }
   0x5   :  { %1016 = vsyncadd [#allocation3], 4294955008  ;;  %v83_v0 = vld [vmem:[#allocation2 + $0x170] sm:$0xff]  ;;  %v84_v1 = vld [vmem:[#allocation2 + $0x178] sm:$0xff]  ;;  %v217_v50 = vlaneseq  ;;  %v1020_v62 = vmov 0.0   ;;  %vm249_vm4 = vcmask 130048  }
   0x6   :  { %v80_v2 = vld [vmem:[#allocation2 + $0x158] sm:$0xff]  ;;  %171 = vmatpush.msra.mxu1 %v83_v0  ;;  %194 = vmatpush.msra.mxu2 %v84_v1  ;;  %v81_v3 = vld [vmem:[#allocation2 + $0x160] sm:$0xff]  ;;  %v78_v5 = vld [vmem:[#allocation2 + $0x148] sm:$0xff] }
   0x7   :  { %v77_v4 = vld [vmem:[#allocation2 + $0x140] sm:$0xff]  ;;  %v74_v6 = vld [vmem:[#allocation2 + $0x128] sm:$0xff]  ;;  %v75_v7 = vld [vmem:[#allocation2 + $0x130] sm:$0xff]  ;;  %v1065_v52 = vand.u32 127, %v217_v50 }
   0x8   :  { %172 = vmatpush.msra.mxu1 %v80_v2  ;;  %195 = vmatpush.msra.mxu2 %v81_v3  ;;  %v82_v8 = vld [vmem:[#allocation2 + $0x168] sm:$0xff]  ;;  %v79_v9 = vld [vmem:[#allocation2 + $0x150] sm:$0xff]  ;;  %v72_v11 = vld [vmem:[#allocation2 + $0x118] sm:$0xff] }
   0x9   :  { %v71_v10 = vld [vmem:[#allocation2 + $0x110] sm:$0xff]  ;;  %148 = vmatpush.msra.mxu0 %v82_v8  ;;  %v76_v12 = vld [vmem:[#allocation2 + $0x138] sm:$0xff]  ;;  %v69_v14 = vld [vmem:[#allocation2 + $0x100] sm:$0xff]  ;;  %vm442_vm0 = vcmp.ge.s32.totalorder %v1065_v52, 16  ;;  %vm443_vm1 = vcmp.lt.s32.totalorder %v1065_v52, 24  ;;  %vm220_vm2 = vcmp.lt.s32.totalorder %v1065_v52, 8 }
   0xa   :  { %173 = vmatpush.msra.mxu1 %v77_v4  ;;  %196 = vmatpush.msra.mxu2 %v78_v5  ;;  %v68_v13 = vld [vmem:[#allocation2 + $0xf8] sm:$0xff]  ;;  %v73_v15 = vld [vmem:[#allocation2 + $0x120] sm:$0xff]  ;;  %v66_v17 = vld [vmem:[#allocation2 + $0xe8] sm:$0xff]  ;;  %v1080_v63 = vsel %vm220_vm2, 1.0, %v1020_v62  ;;  %vm331_vm13 = vcmp.ge.s32.totalorder %v1065_v52, 8  ;;  %vm332_vm14 = vcmp.lt.s32.totalorder %v1065_v52, 16 }
   0xb   :  { %149 = vmatpush.msra.mxu0 %v79_v9  ;;  %v65_v16 = vld [vmem:[#allocation2 + $0xe0] sm:$0xff]  ;;  %v70_v18 = vld [vmem:[#allocation2 + $0x108] sm:$0xff]  ;;  %v63_v20 = vld [vmem:[#allocation2 + $0xd0] sm:$0xff] }
   0xc   :  { %174 = vmatpush.msra.mxu1 %v74_v6  ;;  %197 = vmatpush.msra.mxu2 %v75_v7  ;;  %v62_v19 = vld [vmem:[#allocation2 + $0xc8] sm:$0xff]  ;;  %v67_v21 = vld [vmem:[#allocation2 + $0xf0] sm:$0xff]  ;;  %v60_v23 = vld [vmem:[#allocation2 + $0xb8] sm:$0xff] }
   0xd   :  { %150 = vmatpush.msra.mxu0 %v76_v12  ;;  %v59_v22 = vld [vmem:[#allocation2 + $0xb0] sm:$0xff]  ;;  %v64_v24 = vld [vmem:[#allocation2 + $0xd8] sm:$0xff]  ;;  %v57_v26 = vld [vmem:[#allocation2 + $0xa0] sm:$0xff] }
   0xe   :  { %175 = vmatpush.msra.mxu1 %v71_v10  ;;  %198 = vmatpush.msra.mxu2 %v72_v11  ;;  %v56_v25 = vld [vmem:[#allocation2 + $0x98] sm:$0xff]  ;;  %v61_v27 = vld [vmem:[#allocation2 + $0xc0] sm:$0xff]  ;;  %v54_v29 = vld [vmem:[#allocation2 + $0x88] sm:$0xff] }
   0xf   :  { %151 = vmatpush.msra.mxu0 %v73_v15  ;;  %v53_v28 = vld [vmem:[#allocation2 + $0x80] sm:$0xff]  ;;  %v58_v30 = vld [vmem:[#allocation2 + $0xa8] sm:$0xff]  ;;  %v51_v32 = vld [vmem:[#allocation2 + $0x70] sm:$0xff] }
  0x10   :  { %176 = vmatpush.msra.mxu1 %v68_v13  ;;  %199 = vmatpush.msra.mxu2 %v69_v14  ;;  %v50_v31 = vld [vmem:[#allocation2 + $0x68] sm:$0xff]  ;;  %v55_v33 = vld [vmem:[#allocation2 + $0x90] sm:$0xff]  ;;  %v48_v35 = vld [vmem:[#allocation2 + $0x58] sm:$0xff] }
  0x11   :  { %152 = vmatpush.msra.mxu0 %v70_v18  ;;  %v47_v34 = vld [vmem:[#allocation2 + $0x50] sm:$0xff]  ;;  %v52_v36 = vld [vmem:[#allocation2 + $0x78] sm:$0xff]  ;;  %v45_v38 = vld [vmem:[#allocation2 + $0x40] sm:$0xff] }
  0x12   :  { %177 = vmatpush.msra.mxu1 %v65_v16  ;;  %200 = vmatpush.msra.mxu2 %v66_v17  ;;  %v44_v37 = vld [vmem:[#allocation2 + $0x38] sm:$0xff]  ;;  %v49_v39 = vld [vmem:[#allocation2 + $0x60] sm:$0xff]  ;;  %v42_v41 = vld [vmem:[#allocation2 + $0x28] sm:$0xff] }
  0x13   :  { %153 = vmatpush.msra.mxu0 %v67_v21  ;;  %v41_v40 = vld [vmem:[#allocation2 + $0x20] sm:$0xff]  ;;  %v46_v42 = vld [vmem:[#allocation2 + $0x48] sm:$0xff]  ;;  %v39_v44 = vld [vmem:[#allocation2 + $0x10] sm:$0xff] }
  0x14   :  { %178 = vmatpush.msra.mxu1 %v62_v19  ;;  %201 = vmatpush.msra.mxu2 %v63_v20  ;;  %v38_v43 = vld [vmem:[#allocation2 + $0x8] sm:$0xff]  ;;  %v1052_v45 = vld [vmem:[%s1281_s0] sm:$0xff]  ;;  %v43_v46 = vld [vmem:[#allocation2 + $0x30] sm:$0xff] }
  0x15   :  { %154 = vmatpush.msra.mxu0 %v64_v24  ;;  %v40_v47 = vld [vmem:[#allocation2 + $0x18] sm:$0xff]  ;;  %v37_v48 = vld [vmem:[#allocation2] sm:$0xff]  ;;  %v1059_v49 = vld [vmem:[%s1281_s0 + $0x8] sm:$0xff] }
  0x16   :  { %179 = vmatpush.msra.mxu1 %v59_v22  ;;  %202 = vmatpush.msra.mxu2 %v60_v23  ;;  %v133_v53 = vld [vmem:[%s1284_s3] ss:$8 sm:$0x7]  ;;  %vm444_vm3 = vmand %vm442_vm0, %vm443_vm1 }
  0x17   :  { %155 = vmatpush.msra.mxu0 %v61_v27  ;;  %v142_v55 = vperm.slane %v133_v53, 0  ;;  %v143_v57 = vperm.slane %v133_v53, 1  ;;  %v144_v61 = vperm.slane %v133_v53, 2  ;;  %v1083_v0 = vsel %vm444_vm3, 1.0, %v1020_v62  ;;  %v1116_v11 = vld [vmem:[%s1282_s1] sm:$0xff]  ;;  %v1123_v15 = vld [vmem:[%s1282_s1 + $0x8] sm:$0xff]  ;;  %vm333_vm15 = vmand %vm331_vm13, %vm332_vm14 }
  0x18   :  { %180 = vmatpush.msra.mxu1 %v56_v25  ;;  %203 = vmatpush.msra.mxu2 %v57_v26 }
  0x19   :  { %156 = vmatpush.msra.mxu0 %v58_v30 }
  0x1a   :  { %181 = vmatpush.msra.mxu1 %v53_v28  ;;  %204 = vmatpush.msra.mxu2 %v54_v29 }
  0x1b   :  { %157 = vmatpush.msra.mxu0 %v55_v33 }
  0x1c   :  { %182 = vmatpush.msra.mxu1 %v50_v31  ;;  %205 = vmatpush.msra.mxu2 %v51_v32 }
  0x1d   :  { %158 = vmatpush.msra.mxu0 %v52_v36 }
  0x1e   :  { %183 = vmatpush.msra.mxu1 %v47_v34  ;;  %206 = vmatpush.msra.mxu2 %v48_v35 }
  0x1f   :  { %159 = vmatpush.msra.mxu0 %v49_v39 }
  0x20   :  { %184 = vmatpush.msra.mxu1 %v44_v37  ;;  %207 = vmatpush.msra.mxu2 %v45_v38 }
  0x21   :  { %160 = vmatpush.msra.mxu0 %v46_v42 }
  0x22   :  { %185 = vmatpush.msra.mxu1 %v41_v40  ;;  %208 = vmatpush.msra.mxu2 %v42_v41 }
  0x23   :  { %161 = vmatpush.msra.mxu0 %v43_v46 }
  0x24   :  { %186 = vmatpush.msra.mxu1 %v38_v43  ;;  %209 = vmatpush.msra.mxu2 %v39_v44 }
  0x25   :  { %187 = vmatmul.f32.vlgmr.msra.gmra.mxu1 %v1052_v45  ;;  %210 = vmatmul.f32.vlgmr.msra.gmra.mxu2 %v1052_v45 }
  0x26   :  { %162 = vmatpush.msra.mxu0 %v40_v47 }
  0x28   :  { %163 = vmatpush.msra.mxu0 %v37_v48 }
  0x29   :  { %164 = vmatmul.f32.vlgmr.msra.gmra.mxu0 %v1052_v45 }
  0x2d   :  { %190 = vmatmul.f32.gmra.mxu1 %v1059_v49  ;;  %213 = vmatmul.f32.gmra.mxu2 %v1059_v49 }
  0x31   :  { %167 = vmatmul.f32.gmra.mxu0 %v1059_v49 }
  0xa2   :  { %v188_v51 = vpop.f32.mrf.mxu1 }
  0xa3   :  { %v1085_v1 = vadd.f32 %v188_v51, %v143_v57 }
  0xa6   :  { %v165_v56 = vpop.f32.mrf.mxu0 }
  0xa7   :  { %v1075_v60 = vadd.f32 %v165_v56, %v142_v55 }
  0xa8   :  { %v211_v54 = vpop.f32.mrf.mxu2 }
  0xa9   :  { %v224_v3 = vmul.f32 %v1080_v63, %v1075_v60  ;;  %v447_v4 = vmul.f32 %v1083_v0, %v1075_v60  ;;  %v1091_v5 = vadd.f32 %v211_v54, %v144_v61 }
  0xaa   :  { %v191_v58 = vpop.f32.mrf.mxu1 }
  0xab   :  { %v1073_v59 = vadd.f32 %v191_v58, %v143_v57 }
  0xad   :  { %240 = vmatpush.xpose.msrb.mxu0 %v1073_v59  ;;  %463 = vmatpush.xpose.msrb.mxu1 %v1073_v59 }
  0xae   :  { %v168_v7 = vpop.f32.mrf.mxu0 }
  0xaf   :  { %v1099_v8 = vadd.f32 %v168_v7, %v142_v55 }
  0xb0   :  { %v214_v2 = vpop.f32.mrf.mxu2 }
  0xb1   :  { %v1093_v6 = vadd.f32 %v214_v2, %v144_v61  ;;  %241 = vmatpush.xpose.msrb.mxu0 %v1085_v1  ;;  %464 = vmatpush.xpose.msrb.mxu1 %v1085_v1  ;;  %v225_v9 = vmul.f32 %v1080_v63, %v1099_v8  ;;  %v448_v10 = vmul.f32 %v1083_v0, %v1099_v8  ;;  %v1141_v61 = vsel %vm333_vm15, 1.0, %v1020_v62 }
  0xb2   :  { %v336_v2 = vmul.f32 %v1141_v61, %v1075_v60 }
  0xb3   :  { %318 = vmatpush.msra.mxu3 %v1093_v6  ;;  %540 = vmatpush.msrb.mxu2 %v1093_v6 }
  0xb4   :  { %242 = vmatmul.f32.vlgmr.msrb.gmra.mxu0 %v224_v3  ;;  %465 = vmatmul.f32.vlgmr.msrb.gmra.mxu1 %v447_v4  ;;  %v337_v3 = vmul.f32 %v1141_v61, %v1099_v8 }
  0xb5   :  { %429 = vmatpush.msra.mxu0 %v1093_v6  ;;  %319 = vmatpush.msra.mxu3 %v1091_v5 }
  0xb6   :  { %541 = vmatpush.msrb.mxu2 %v1091_v5 }
  0xb7   :  { %430 = vmatpush.msra.mxu0 %v1091_v5  ;;  %352 = vmatpush.xpose.msrb.mxu3 %v1073_v59 }
  0xb9   :  { %651 = vmatpush.msrb.mxu0 %v1093_v6 }
  0xbb   :  { %652 = vmatpush.msrb.mxu0 %v1091_v5  ;;  %353 = vmatpush.xpose.msrb.mxu3 %v1085_v1 }
  0xbc   :  { %245 = vmatmul.f32.gmra.mxu0 %v225_v9  ;;  %468 = vmatmul.f32.gmra.mxu1 %v448_v10 }
 0x131   :  { %v243_v12 = vpop.f32.mrf.mxu0  ;;  %v466_v29 = vpop.f32.mrf.mxu1 }
 0x132   :  { %v244_v13 = vadd.f32 %v243_v12, %v1116_v11  ;;  %v1130_v30 = vadd.f32 %v466_v29, %v1116_v11 }
 0x134   :  { %v250_v14 = vsel %vm249_vm4, %v244_v13, -inf  ;;  %v472_v31 = vsel %vm249_vm4, %v1130_v30, -inf }
 0x135   :  { %251 = vmax.xlane.f32.xlu0 %v250_v14 }
 0x139   :  { %v246_v16 = vpop.f32.mrf.mxu0 }
 0x13a   :  { %v247_v17 = vadd.f32 %v246_v16, %v1123_v15 }
 0x13c   :  { %v253_v18 = vsel %vm249_vm4, %v247_v17, -inf }
 0x13d   :  { %254 = vmax.xlane.f32.xlu0 %v253_v18 }
 0x1a8   :  { %v252_v19 = vpop.xlane.xlu0 %251 }
 0x1a9   :  { %v256_v20 = vsub.f32 %v244_v13, %v252_v19 }
 0x1ab   :  { %v258_v21 = vmul.f32 1.442695, %v256_v20  ;;  %v469_v20 = vpop.f32.mrf.mxu1 }
 0x1ad   :  { %947 = vpow2.f32 %v258_v21 }
 0x1b0   :  { %v255_v22 = vpop.xlane.xlu0 %254 }
 0x1b1   :  { %v257_v23 = vsub.f32 %v247_v17, %v255_v22  ;;  %v1159_v22 = vadd.f32 %v469_v20, %v1123_v15 }
 0x1b3   :  { %v948_v24 = vpop.eup %947  ;;  %v260_v25 = vmul.f32 1.442695, %v257_v23  ;;  %v475_v23 = vsel %vm249_vm4, %v1159_v22, -inf }
 0x1b4   :  { %v262_v26 = vsel %vm249_vm4, %v948_v24, 0.0 }
 0x1b5   :  { %949 = vpow2.f32 %v260_v25  ;;  %263 = vadd.xlane.f32.xlu1 %v262_v26 }
 0x1bb   :  { %v950_v27 = vpop.eup %949 }
 0x1bc   :  { %v265_v28 = vsel %vm249_vm4, %v950_v27, 0.0 }
 0x1bd   :  { %266 = vadd.xlane.f32.xlu1 %v265_v28 }
 0x1c5   :  { %473 = vmax.xlane.f32.xlu1 %v472_v31 }
 0x228   :  { %v264_v32 = vpop.xlane.xlu1 %263 }
 0x229   :  { %951 = vrcp.f32 %v264_v32  ;;  %v279_v37 = vand.u32 2147483648, %v264_v32  ;;  %v277_v39 = vand.u32 2147483647, %v264_v32  ;;  %vm273_vm6 = vweird.f32 %v264_v32 }
 0x22b   :  { %v280_v42 = vor.u32 1.1754944e-38, %v279_v37  ;;  %vm278_vm8 = vcmp.eq.f32.partialorder %v277_v39, 8.507059e+37 }
 0x22f   :  { %v952_v33 = vpop.eup %951 }
 0x230   :  { %v269_v34 = vmul.f32 %v952_v33, %v264_v32  ;;  %v267_v35 = vpop.xlane.xlu1 %266  ;;  %vm274_vm5 = vweird.f32 %v952_v33 }
 0x231   :  { %953 = vrcp.f32 %v267_v35  ;;  %vm275_vm7 = vmor %vm273_vm6, %vm274_vm5  ;;  %v294_v50 = vand.u32 2147483648, %v267_v35  ;;  %v292_v53 = vand.u32 2147483647, %v267_v35  ;;  %vm288_vm10 = vweird.f32 %v267_v35 }
 0x232   :  { %v270_v36 = vsub.f32 1.0, %v269_v34  ;;  %vm553_vm5 = vcmp.ge.s32.totalorder %v1065_v52, 24  ;;  %vm554_vm6 = vcmp.lt.s32.totalorder %v1065_v52, 32  ;;  %v113_v52 = vld [vmem:[#allocation2 + $0x2a8] sm:$0xff] }
 0x233   :  { %v295_v55 = vor.u32 1.1754944e-38, %v294_v50  ;;  %vm293_vm12 = vcmp.eq.f32.partialorder %v292_v53, 8.507059e+37 }
 0x234   :  { %v271_v38 = vmul.f32 %v952_v33, %v270_v36 }
 0x236   :  { %v272_v40 = vadd.f32 %v952_v33, %v271_v38 }
 0x237   :  { %v954_v41 = vpop.eup %953 }
 0x238   :  { %v284_v43 = vmul.f32 %v954_v41, %v267_v35  ;;  %v276_v44 = vsel %vm275_vm7, %v952_v33, %v272_v40  ;;  %vm289_vm9 = vweird.f32 %v954_v41  ;;  %vm555_vm7 = vmand %vm553_vm5, %vm554_vm6 }
 0x239   :  { %v281_v46 = vsel %vm278_vm8, %v280_v42, %v276_v44  ;;  %vm290_vm11 = vmor %vm288_vm10, %vm289_vm9  ;;  %v1170_v42 = vsel %vm555_vm7, 1.0, %v1020_v62 }
 0x23a   :  { %v285_v47 = vsub.f32 1.0, %v284_v43  ;;  %v282_v48 = vmul.f32 %v948_v24, %v281_v46  ;;  %v558_v46 = vmul.f32 %v1170_v42, %v1075_v60  ;;  %v474_v60 = vpop.xlane.xlu1 %473 }
 0x23c   :  { %v286_v51 = vmul.f32 %v954_v41, %v285_v47  ;;  %927 = vmatmul.msk.f32.vlgmr.msra.gmra.mxu3 %vm249_vm4, %v282_v48 }
 0x23d   :  { %941 = vmatpush.msra.mxu3 %v1093_v6 }
 0x23e   :  { %v287_v54 = vadd.f32 %v954_v41, %v286_v51 }
 0x23f   :  { %942 = vmatpush.msra.mxu3 %v1091_v5 }
 0x240   :  { %v291_v56 = vsel %vm290_vm11, %v954_v41, %v287_v54 }
 0x241   :  { %v296_v57 = vsel %vm293_vm12, %v295_v55, %v291_v56 }
 0x242   :  { %v297_v58 = vmul.f32 %v950_v27, %v296_v57  ;;  %v559_v57 = vmul.f32 %v1170_v42, %v1099_v8 }
 0x244   :  { %928 = vmatmul.msk.f32.gmra.mxu3 %vm249_vm4, %v297_v58 }
 0x24c   :  { %354 = vmatmul.f32.vlgmr.msrb.gmra.mxu3 %v336_v2 }
 0x24d   :  { %574 = vmatpush.xpose.msrb.mxu3 %v1073_v59 }
 0x251   :  { %575 = vmatpush.xpose.msrb.mxu3 %v1085_v1 }
 0x254   :  { %357 = vmatmul.f32.gmra.mxu3 %v337_v3 }
 0x2bf   :  { %v1149_v4 = vpop.f32.mrf.mxu3 }
 0x2c7   :  { %v1151_v5 = vpop.f32.mrf.mxu3 }
 0x2c8   :  { %v328_v2 = vmul.f32 %v1080_v63, %v1151_v5 }
 0x2cf   :  { %v355_v6 = vpop.f32.mrf.mxu3 }
 0x2d0   :  { %v356_v7 = vadd.f32 %v355_v6, %v1116_v11  ;;  %v478_v6 = vsub.f32 %v1130_v30, %v474_v60 }
 0x2d2   :  { %v361_v9 = vsel %vm249_vm4, %v356_v7, -inf }
 0x2d3   :  { %362 = vmax.xlane.f32.xlu0 %v361_v9  ;;  %v480_v9 = vmul.f32 1.442695, %v478_v6  ;;  %v99_v6 = vld [vmem:[#allocation2 + $0x2d0] sm:$0xff] }
 0x2d7   :  { %v358_v10 = vpop.f32.mrf.mxu3 }
 0x2d8   :  { %v359_v12 = vadd.f32 %v358_v10, %v1123_v15 }
 0x2da   :  { %v364_v59 = vsel %vm249_vm4, %v359_v12, -inf }
 0x2db   :  { %365 = vmax.xlane.f32.xlu2 %v364_v59 }
 0x346   :  { %v363_v16 = vpop.xlane.xlu0 %362 }
 0x347   :  { %v367_v18 = vsub.f32 %v356_v7, %v363_v16 }
 0x349   :  { %v369_v21 = vmul.f32 1.442695, %v367_v18 }
 0x34e   :  { %v366_v1 = vpop.xlane.xlu2 %365 }
 0x34f   :  { %v368_v13 = vsub.f32 %v359_v12, %v366_v1 }
 0x351   :  { %v371_v14 = vmul.f32 1.442695, %v368_v13 }
 0x353   :  { %955 = vpow2.f32 %v371_v14 }
 0x354   :  { %957 = vpow2.f32 %v369_v21 }
 0x359   :  { %v956_v17 = vpop.eup %955 }
 0x35a   :  { %v376_v19 = vsel %vm249_vm4, %v956_v17, 0.0  ;;  %v958_v24 = vpop.eup %957 }
 0x35b   :  { %377 = vadd.xlane.f32.xlu2 %v376_v19  ;;  %v373_v25 = vsel %vm249_vm4, %v958_v24, 0.0 }
 0x363   :  { %476 = vmax.xlane.f32.xlu2 %v475_v23 }
 0x36b   :  { %374 = vadd.xlane.f32.xlu2 %v373_v25 }
 0x3ce   :  { %v378_v26 = vpop.xlane.xlu2 %377 }
 0x3cf   :  { %959 = vrcp.f32 %v378_v26  ;;  %v405_v32 = vand.u32 2147483648, %v378_v26  ;;  %v403_v34 = vand.u32 2147483647, %v378_v26  ;;  %vm399_vm1 = vweird.f32 %v378_v26 }
 0x3d1   :  { %v406_v36 = vor.u32 1.1754944e-38, %v405_v32  ;;  %vm404_vm3 = vcmp.eq.f32.partialorder %v403_v34, 8.507059e+37 }
 0x3d5   :  { %v960_v27 = vpop.eup %959 }
 0x3d6   :  { %v395_v28 = vmul.f32 %v960_v27, %v378_v26  ;;  %v477_v29 = vpop.xlane.xlu2 %476  ;;  %vm400_vm0 = vweird.f32 %v960_v27 }
 0x3d7   :  { %vm401_vm2 = vmor %vm399_vm1, %vm400_vm0  ;;  %v479_v8 = vsub.f32 %v1159_v22, %v477_v29 }
 0x3d8   :  { %v396_v31 = vsub.f32 1.0, %v395_v28 }
 0x3d9   :  { %v482_v1 = vmul.f32 1.442695, %v479_v8  ;;  %v98_v8 = vld [vmem:[#allocation2 + $0x2b8] sm:$0xff] }
 0x3da   :  { %v397_v33 = vmul.f32 %v960_v27, %v396_v31 }
 0x3dc   :  { %v398_v35 = vadd.f32 %v960_v27, %v397_v33 }
 0x3de   :  { %v402_v37 = vsel %vm401_vm2, %v960_v27, %v398_v35  ;;  %v375_v38 = vpop.xlane.xlu2 %374 }
 0x3df   :  { %v407_v39 = vsel %vm404_vm3, %v406_v36, %v402_v37  ;;  %961 = vrcp.f32 %v375_v38  ;;  %v390_v47 = vand.u32 2147483648, %v375_v38  ;;  %v388_v50 = vand.u32 2147483647, %v375_v38 }
 0x3e0   :  { %v408_v40 = vmul.f32 %v956_v17, %v407_v39  ;;  %vm384_vm9 = vweird.f32 %v375_v38  ;;  %963 = vpow2.f32 %v480_v9 }
 0x3e1   :  { %v391_v53 = vor.u32 1.1754944e-38, %v390_v47  ;;  %vm389_vm11 = vcmp.eq.f32.partialorder %v388_v50, 8.507059e+37  ;;  %965 = vpow2.f32 %v482_v1  ;;  %v97_v1 = vld [vmem:[#allocation2 + $0x2a0] sm:$0xff] }
 0x3e2   :  { %931 = vmatmul.msk.f32.vlgmr.msra.gmra.mxu3 %vm249_vm4, %v408_v40 }
 0x3e5   :  { %v962_v41 = vpop.eup %961 }
 0x3e6   :  { %v380_v43 = vmul.f32 %v962_v41, %v375_v38  ;;  %vm385_vm8 = vweird.f32 %v962_v41  ;;  %v964_v13 = vpop.eup %963 }
 0x3e7   :  { %vm386_vm10 = vmor %vm384_vm9, %vm385_vm8  ;;  %v484_v16 = vsel %vm249_vm4, %v964_v13, 0.0  ;;  %v966_v17 = vpop.eup %965 }
 0x3e8   :  { %v381_v44 = vsub.f32 1.0, %v380_v43 }
 0x3ea   :  { %v382_v48 = vmul.f32 %v962_v41, %v381_v44  ;;  %576 = vmatmul.f32.vlgmr.msrb.gmra.mxu3 %v558_v46 }
 0x3ec   :  { %v383_v51 = vadd.f32 %v962_v41, %v382_v48 }
 0x3ee   :  { %v387_v54 = vsel %vm386_vm10, %v962_v41, %v383_v51 }
 0x3ef   :  { %v392_v55 = vsel %vm389_vm11, %v391_v53, %v387_v54 }
 0x3f0   :  { %v393_v56 = vmul.f32 %v958_v24, %v392_v55 }
 0x3f2   :  { %930 = vmatmul.msk.f32.vlgmr.msra.gmra.mxu0 %vm249_vm4, %v393_v56  ;;  %579 = vmatmul.f32.gmra.mxu3 %v559_v57 }
 0x465   :  { %v435_v58 = vpop.f32.mrf.mxu3 }
 0x466   :  { %v439_v3 = vmul.f32 %v1141_v61, %v435_v58 }
 0x468   :  { %v1181_v7 = vadd.f32 %v439_v3, %v328_v2  ;;  %v100_v3 = vld [vmem:[#allocation2 + $0x2e8] sm:$0xff] }
 0x469   :  { %664 = vmatpush.msra.mxu1 %v100_v3  ;;  %v116_v3 = vld [vmem:[#allocation2 + $0x2f0] sm:$0xff] }
 0x46a   :  { %737 = vmatpush.msra.mxu2 %v116_v3 }
 0x46b   :  { %665 = vmatpush.msra.mxu1 %v99_v6 }
 0x46d   :  { %v577_v10 = vpop.f32.mrf.mxu3  ;;  %666 = vmatpush.msra.mxu1 %v98_v8 }
 0x46e   :  { %v578_v12 = vadd.f32 %v577_v10, %v1116_v11  ;;  %v487_v11 = vsel %vm249_vm4, %v966_v17, 0.0 }
 0x46f   :  { %667 = vmatpush.msra.mxu1 %v97_v1 }
 0x470   :  { %v583_v59 = vsel %vm249_vm4, %v578_v12, -inf }
 0x471   :  { %584 = vmax.xlane.f32.xlu0 %v583_v59 }
 0x475   :  { %v580_v14 = vpop.f32.mrf.mxu3 }
 0x476   :  { %v581_v5 = vadd.f32 %v580_v14, %v1123_v15 }
 0x478   :  { %v586_v30 = vsel %vm249_vm4, %v581_v5, -inf }
 0x479   :  { %587 = vmax.xlane.f32.xlu1 %v586_v30  ;;  %485 = vadd.xlane.f32.xlu0 %v484_v16  ;;  %v96_v30 = vld [vmem:[#allocation2 + $0x288] sm:$0xff] }
 0x47a   :  { %668 = vmatpush.msra.mxu1 %v96_v30  ;;  %v110_v30 = vld [vmem:[#allocation2 + $0x260] sm:$0xff] }
 0x481   :  { %488 = vadd.xlane.f32.xlu1 %v487_v11 }
 0x4e4   :  { %v585_v18 = vpop.xlane.xlu0 %584 }
 0x4e5   :  { %v589_v19 = vsub.f32 %v578_v12, %v585_v18  ;;  %v95_v18 = vld [vmem:[#allocation2 + $0x270] sm:$0xff] }
 0x4e6   :  { %669 = vmatpush.msra.mxu1 %v95_v18  ;;  %v106_v18 = vld [vmem:[#allocation2 + $0x200] sm:$0xff] }
 0x4e7   :  { %v591_v20 = vmul.f32 1.442695, %v589_v19 }
 0x4e9   :  { %967 = vpow2.f32 %v591_v20 }
 0x4ec   :  { %v486_v21 = vpop.xlane.xlu0 %485  ;;  %v588_v22 = vpop.xlane.xlu1 %587 }
 0x4ed   :  { %969 = vrcp.f32 %v486_v21  ;;  %v590_v23 = vsub.f32 %v581_v5, %v588_v22  ;;  %v501_v31 = vand.u32 2147483648, %v486_v21  ;;  %v499_v34 = vand.u32 2147483647, %v486_v21 }
 0x4ee   :  { %vm495_vm13 = vweird.f32 %v486_v21 }
 0x4ef   :  { %v1190_v15 = vpop.eup %967  ;;  %v593_v24 = vmul.f32 1.442695, %v590_v23  ;;  %v502_v38 = vor.u32 1.1754944e-38, %v501_v31  ;;  %vm500_vm15 = vcmp.eq.f32.partialorder %v499_v34, 8.507059e+37  ;;  %v89_v34 = vld [vmem:[#allocation2 + $0x1e0] sm:$0xff] }
 0x4f0   :  { %v595_v25 = vsel %vm249_vm4, %v1190_v15, 0.0 }
 0x4f1   :  { %596 = vadd.xlane.f32.xlu2 %v595_v25  ;;  %971 = vpow2.f32 %v593_v24  ;;  %v93_v24 = vld [vmem:[#allocation2 + $0x240] sm:$0xff] }
 0x4f3   :  { %v970_v26 = vpop.eup %969 }
 0x4f4   :  { %v491_v27 = vmul.f32 %v970_v26, %v486_v21  ;;  %v489_v28 = vpop.xlane.xlu1 %488  ;;  %vm496_vm12 = vweird.f32 %v970_v26  ;;  %v94_v21 = vld [vmem:[#allocation2 + $0x258] sm:$0xff] }
 0x4f5   :  { %973 = vrcp.f32 %v489_v28  ;;  %vm497_vm14 = vmor %vm495_vm13, %vm496_vm12  ;;  %v516_v46 = vand.u32 2147483648, %v489_v28  ;;  %v514_v48 = vand.u32 2147483647, %v489_v28  ;;  %vm510_vm1 = vweird.f32 %v489_v28  ;;  %670 = vmatpush.msra.mxu1 %v94_v21  ;;  %v103_v21 = vld [vmem:[#allocation2 + $0x1b8] sm:$0xff] }
 0x4f6   :  { %v492_v29 = vsub.f32 1.0, %v491_v27  ;;  %v92_v27 = vld [vmem:[#allocation2 + $0x228] sm:$0xff] }
 0x4f7   :  { %v1194_v32 = vpop.eup %971  ;;  %v517_v51 = vor.u32 1.1754944e-38, %v516_v46  ;;  %vm515_vm3 = vcmp.eq.f32.partialorder %v514_v48, 8.507059e+37  ;;  %671 = vmatpush.msra.mxu1 %v93_v24 }
 0x4f8   :  { %v493_v33 = vmul.f32 %v970_v26, %v492_v29  ;;  %v598_v35 = vsel %vm249_vm4, %v1194_v32, 0.0  ;;  %v91_v29 = vld [vmem:[#allocation2 + $0x210] sm:$0xff] }
 0x4f9   :  { %599 = vadd.xlane.f32.xlu0 %v598_v35  ;;  %672 = vmatpush.msra.mxu1 %v92_v27  ;;  %v88_v35 = vld [vmem:[#allocation2 + $0x1c8] sm:$0xff] }
 0x4fa   :  { %v494_v36 = vadd.f32 %v970_v26, %v493_v33  ;;  %v90_v33 = vld [vmem:[#allocation2 + $0x1f8] sm:$0xff] }
 0x4fb   :  { %v974_v37 = vpop.eup %973  ;;  %673 = vmatpush.msra.mxu1 %v91_v29 }
 0x4fc   :  { %v506_v39 = vmul.f32 %v974_v37, %v489_v28  ;;  %v498_v40 = vsel %vm497_vm14, %v970_v26, %v494_v36  ;;  %vm511_vm0 = vweird.f32 %v974_v37  ;;  %v87_v36 = vld [vmem:[#allocation2 + $0x1b0] sm:$0xff] }
 0x4fd   :  { %v503_v41 = vsel %vm500_vm15, %v502_v38, %v498_v40  ;;  %vm512_vm2 = vmor %vm510_vm1, %vm511_vm0  ;;  %674 = vmatpush.msra.mxu1 %v90_v33  ;;  %v85_v38 = vld [vmem:[#allocation2 + $0x180] sm:$0xff] }
 0x4fe   :  { %v507_v43 = vsub.f32 1.0, %v506_v39  ;;  %v504_v44 = vmul.f32 %v964_v13, %v503_v41  ;;  %v432_v39 = vpop.f32.mrf.mxu0  ;;  %v327_v41 = vmul.f32 %v1080_v63, %v1149_v4  ;;  %v134_v63 = vld [vmem:[%s1284_s3 + $0x1] ss:$0 sm:$0xff] }
 0x4ff   :  { %675 = vmatpush.msra.mxu1 %v89_v34 }
 0x500   :  { %v508_v47 = vmul.f32 %v974_v37, %v507_v43  ;;  %933 = vmatmul.msk.f32.vlgmr.msrb.gmra.mxu2 %vm249_vm4, %v504_v44 }
 0x501   :  { %676 = vmatpush.msra.mxu1 %v88_v35 }
 0x502   :  { %v509_v50 = vadd.f32 %v974_v37, %v508_v47 }
 0x503   :  { %677 = vmatpush.msra.mxu1 %v87_v36 }
 0x504   :  { %v513_v53 = vsel %vm512_vm2, %v974_v37, %v509_v50  ;;  %v86_v37 = vld [vmem:[#allocation2 + $0x198] sm:$0xff] }
 0x505   :  { %v518_v54 = vsel %vm515_vm3, %v517_v51, %v513_v53  ;;  %678 = vmatpush.msra.mxu1 %v86_v37 }
 0x506   :  { %v519_v55 = vmul.f32 %v966_v17, %v518_v54 }
 0x507   :  { %679 = vmatpush.msra.mxu1 %v85_v38 }
 0x508   :  { %934 = vmatmul.msk.f32.gmra.mxu2 %vm249_vm4, %v519_v55 }
 0x564   :  { %v597_v56 = vpop.xlane.xlu2 %596 }
 0x565   :  { %975 = vrcp.f32 %v597_v56  ;;  %v612_v9 = vand.u32 2147483648, %v597_v56  ;;  %v610_v12 = vand.u32 2147483647, %v597_v56  ;;  %vm606_vm7 = vweird.f32 %v597_v56 }
 0x567   :  { %v613_v13 = vor.u32 1.1754944e-38, %v612_v9  ;;  %vm611_vm9 = vcmp.eq.f32.partialorder %v610_v12, 8.507059e+37  ;;  %v1220_v9 = vsel %vm554_vm6, 1.0, %v1020_v62  ;;  %v112_v62 = vld [vmem:[#allocation2 + $0x290] sm:$0xff] }
 0x56b   :  { %v976_v57 = vpop.eup %975 }
 0x56c   :  { %v602_v60 = vmul.f32 %v976_v57, %v597_v56  ;;  %v600_v58 = vpop.xlane.xlu0 %599  ;;  %vm607_vm5 = vweird.f32 %v976_v57 }
 0x56d   :  { %977 = vrcp.f32 %v600_v58  ;;  %vm608_vm8 = vmor %vm606_vm7, %vm607_vm5  ;;  %v627_v20 = vand.u32 2147483648, %v600_v58  ;;  %v625_v23 = vand.u32 2147483647, %v600_v58  ;;  %vm621_vm11 = vweird.f32 %v600_v58 }
 0x56e   :  { %v603_v2 = vsub.f32 1.0, %v602_v60 }
 0x56f   :  { %v628_v26 = vor.u32 1.1754944e-38, %v627_v20  ;;  %vm626_vm13 = vcmp.eq.f32.partialorder %v625_v23, 8.507059e+37  ;;  %v104_v20 = vld [vmem:[#allocation2 + $0x1d0] sm:$0xff]  ;;  %v101_v23 = vld [vmem:[#allocation2 + $0x188] sm:$0xff] }
 0x570   :  { %v604_v10 = vmul.f32 %v976_v57, %v603_v2 }
 0x572   :  { %v605_v59 = vadd.f32 %v976_v57, %v604_v10 }
 0x573   :  { %v978_v14 = vpop.eup %977 }
 0x574   :  { %v609_v5 = vsel %vm608_vm8, %v976_v57, %v605_v59  ;;  %v617_v17 = vmul.f32 %v978_v14, %v600_v58  ;;  %vm622_vm10 = vweird.f32 %v978_v14 }
 0x575   :  { %v614_v16 = vsel %vm611_vm9, %v613_v13, %v609_v5  ;;  %vm623_vm12 = vmor %vm621_vm11, %vm622_vm10  ;;  %v111_v5 = vld [vmem:[#allocation2 + $0x278] sm:$0xff] }
 0x576   :  { %v615_v11 = vmul.f32 %v1190_v15, %v614_v16  ;;  %v618_v19 = vsub.f32 1.0, %v617_v17  ;;  %v109_v16 = vld [vmem:[#allocation2 + $0x248] sm:$0xff]  ;;  %v108_v17 = vld [vmem:[#allocation2 + $0x230] sm:$0xff] }
 0x578   :  { %936 = vmatmul.msk.f32.vlgmr.msrb.gmra.mxu0 %vm249_vm4, %v615_v11  ;;  %v619_v22 = vmul.f32 %v978_v14, %v618_v19  ;;  %v107_v11 = vld [vmem:[#allocation2 + $0x218] sm:$0xff]  ;;  %v105_v19 = vld [vmem:[#allocation2 + $0x1e8] sm:$0xff] }
 0x57a   :  { %v620_v25 = vadd.f32 %v978_v14, %v619_v22  ;;  %v102_v22 = vld [vmem:[#allocation2 + $0x1a0] sm:$0xff] }
 0x57c   :  { %v624_v28 = vsel %vm623_vm12, %v978_v14, %v620_v25  ;;  %v114_v14 = vld [vmem:[#allocation2 + $0x2c0] sm:$0xff] }
 0x57d   :  { %v629_v15 = vsel %vm626_vm13, %v628_v26, %v624_v28 }
 0x57e   :  { %v630_v31 = vmul.f32 %v1194_v32, %v629_v15  ;;  %v438_v32 = vmul.f32 %v1141_v61, %v432_v39 }
 0x580   :  { %937 = vmatmul.msk.f32.gmra.mxu0 %vm249_vm4, %v630_v31  ;;  %v440_v44 = vadd.f32 %v438_v32, %v327_v41 }
 0x583   :  { %v543_v40 = vpop.f32.mrf.mxu2 }
 0x584   :  { %v549_v43 = vmul.f32 %v1083_v0, %v543_v40  ;;  %v137_v40 = vld [vmem:[%s1284_s3 + $0x4] ss:$0 sm:$0xff] }
 0x586   :  { %v551_v47 = vadd.f32 %v549_v43, %v440_v44  ;;  %v138_v43 = vld [vmem:[%s1284_s3 + $0x5] ss:$0 sm:$0xff] }
 0x58b   :  { %v546_v50 = vpop.f32.mrf.mxu2 }
 0x58c   :  { %v550_v53 = vmul.f32 %v1083_v0, %v546_v50 }
 0x58e   :  { %v552_v55 = vadd.f32 %v550_v53, %v1181_v7  ;;  %v115_v7 = vld [vmem:[#allocation2 + $0x2d8] sm:$0xff] }
 0x58f   :  { %738 = vmatpush.msra.mxu2 %v115_v7  ;;  %v126_v7 = vld [vmem:[#allocation2 + $0x268] sm:$0xff] }
 0x591   :  { %739 = vmatpush.msra.mxu2 %v114_v14 }
 0x593   :  { %740 = vmatpush.msra.mxu2 %v113_v52 }
 0x595   :  { %741 = vmatpush.msra.mxu2 %v112_v62  ;;  %v122_v62 = vld [vmem:[#allocation2 + $0x208] sm:$0xff] }
 0x597   :  { %742 = vmatpush.msra.mxu2 %v111_v5 }
 0x599   :  { %743 = vmatpush.msra.mxu2 %v110_v30 }
 0x59b   :  { %744 = vmatpush.msra.mxu2 %v109_v16 }
 0x59d   :  { %745 = vmatpush.msra.mxu2 %v108_v17  ;;  %v121_v17 = vld [vmem:[#allocation2 + $0x1f0] sm:$0xff] }
 0x59f   :  { %746 = vmatpush.msra.mxu2 %v107_v11 }
 0x5a1   :  { %747 = vmatpush.msra.mxu2 %v106_v18 }
 0x5a3   :  { %748 = vmatpush.msra.mxu2 %v105_v19 }
 0x5a5   :  { %749 = vmatpush.msra.mxu2 %v104_v20  ;;  %v120_v20 = vld [vmem:[#allocation2 + $0x1d8] sm:$0xff] }
 0x5a7   :  { %750 = vmatpush.msra.mxu2 %v103_v21 }
 0x5a9   :  { %751 = vmatpush.msra.mxu2 %v102_v22 }
 0x5ab   :  { %752 = vmatpush.msra.mxu2 %v101_v23  ;;  %v119_v23 = vld [vmem:[#allocation2 + $0x1c0] sm:$0xff] }
 0x5f5   :  { %v654_v46 = vpop.f32.mrf.mxu0 }
 0x5f6   :  { %v660_v48 = vmul.f32 %v1170_v42, %v654_v46 }
 0x5f8   :  { %v662_v51 = vadd.f32 %v660_v48, %v551_v47 }
 0x5fa   :  { %680 = vmatmul.f32.vlgmr.msra.gmra.mxu1 %v662_v51 }
 0x5fd   :  { %v657_v54 = vpop.f32.mrf.mxu0 }
 0x5fe   :  { %v661_v61 = vmul.f32 %v1170_v42, %v657_v54 }
 0x600   :  { %v663_v56 = vadd.f32 %v661_v61, %v552_v55  ;;  %v132_v61 = vld [vmem:[#allocation2 + $0x2f8] sm:$0xff] }
 0x601   :  { %848 = vmatpush.msra.mxu3 %v132_v61 }
 0x602   :  { %683 = vmatmul.f32.gmra.mxu1 %v663_v56  ;;  %v131_v56 = vld [vmem:[#allocation2 + $0x2e0] sm:$0xff] }
 0x603   :  { %849 = vmatpush.msra.mxu3 %v131_v56 }
 0x677   :  { %v681_v4 = vpop.f32.mrf.mxu1 }
 0x678   :  { %v682_v57 = vadd.f32 %v681_v4, %v134_v63  ;;  %v135_v4 = vld [vmem:[%s1284_s3 + $0x2] ss:$0 sm:$0xff] }
 0x67a   :  { %v689_v60 = vadd.f32 %v682_v57, %v1052_v45  ;;  %v129_v57 = vld [vmem:[#allocation2 + $0x2b0] sm:$0xff] }
 0x67c   :  { %691 = vadd.xlane.f32.xlu1 %v689_v60 }
 0x67f   :  { %v684_v58 = vpop.f32.mrf.mxu1 }
 0x680   :  { %v685_v2 = vadd.f32 %v684_v58, %v134_v63  ;;  %v130_v63 = vld [vmem:[#allocation2 + $0x2c8] sm:$0xff]  ;;  %v128_v58 = vld [vmem:[#allocation2 + $0x298] sm:$0xff] }
 0x681   :  { %850 = vmatpush.msra.mxu3 %v130_v63 }
 0x682   :  { %v690_v0 = vadd.f32 %v685_v2, %v1059_v49 }
 0x683   :  { %851 = vmatpush.msra.mxu3 %v129_v57 }
 0x684   :  { %693 = vadd.xlane.f32.xlu2 %v690_v0 }
 0x685   :  { %852 = vmatpush.msra.mxu3 %v128_v58 }
 0x6ef   :  { %v692_v42 = vpop.xlane.xlu1 %691 }
 0x6f0   :  { %v695_v6 = vmul.f32 0.03125, %v692_v42 }
 0x6f2   :  { %v697_v10 = vsub.f32 %v689_v60, %v695_v6  ;;  %v125_v6 = vld [vmem:[#allocation2 + $0x250] sm:$0xff] }
 0x6f4   :  { %v699_v45 = vmul.f32 %v1220_v9, %v697_v10 }
 0x6f6   :  { %v701_v12 = vmul.f32 %v699_v45, %v699_v45 }
 0x6f7   :  { %v694_v8 = vpop.xlane.xlu2 %693 }
 0x6f8   :  { %703 = vadd.xlane.f32.xlu0 %v701_v12  ;;  %v696_v59 = vmul.f32 0.03125, %v694_v8 }
 0x6fa   :  { %v698_v49 = vsub.f32 %v690_v0, %v696_v59  ;;  %v127_v0 = vld [vmem:[#allocation2 + $0x280] sm:$0xff] }
 0x6fb   :  { %853 = vmatpush.msra.mxu3 %v127_v0 }
 0x6fc   :  { %v1224_v1 = vmul.f32 %v1220_v9, %v698_v49 }
 0x6fd   :  { %854 = vmatpush.msra.mxu3 %v126_v7 }
 0x6fe   :  { %v702_v13 = vmul.f32 %v1224_v1, %v1224_v1 }
 0x6ff   :  { %855 = vmatpush.msra.mxu3 %v125_v6 }
 0x700   :  { %705 = vadd.xlane.f32.xlu1 %v702_v13 }
 0x76b   :  { %v704_v24 = vpop.xlane.xlu0 %703 }
 0x76c   :  { %v707_v25 = vmul.f32 0.03125, %v704_v24 }
 0x76e   :  { %v709_v26 = vadd.f32 1e-05, %v707_v25 }
 0x770   :  { %979 = vrsqrt.f32 %v709_v26  ;;  %vm717_vm6 = vweird.f32 %v709_v26 }
 0x773   :  { %v706_v27 = vpop.xlane.xlu1 %705 }
 0x774   :  { %v708_v28 = vmul.f32 0.03125, %v706_v27 }
 0x776   :  { %v980_v15 = vpop.eup %979  ;;  %v710_v31 = vadd.f32 1e-05, %v708_v28  ;;  %v118_v28 = vld [vmem:[#allocation2 + $0x1a8] sm:$0xff] }
 0x777   :  { %v712_v29 = vmul.f32 %v980_v15, %v709_v26  ;;  %vm718_vm4 = vweird.f32 %v980_v15 }
 0x778   :  { %981 = vrsqrt.f32 %v710_v31  ;;  %vm719_vm14 = vmor %vm717_vm6, %vm718_vm4  ;;  %vm727_vm0 = vweird.f32 %v710_v31 }
 0x779   :  { %v713_v33 = vmul.f32 %v980_v15, %v712_v29 }
 0x77b   :  { %v714_v34 = vmul.f32 0.5, %v713_v33 }
 0x77d   :  { %v715_v35 = vsub.f32 1.5, %v714_v34 }
 0x77e   :  { %v982_v36 = vpop.eup %981 }
 0x77f   :  { %v716_v37 = vmul.f32 %v980_v15, %v715_v35  ;;  %v722_v38 = vmul.f32 %v982_v36, %v710_v31  ;;  %vm728_vm15 = vweird.f32 %v982_v36 }
 0x780   :  { %vm729_vm1 = vmor %vm727_vm0, %vm728_vm15 }
 0x781   :  { %v720_v39 = vsel %vm719_vm14, %v980_v15, %v716_v37  ;;  %v723_v41 = vmul.f32 %v982_v36, %v722_v38  ;;  %v117_v15 = vld [vmem:[#allocation2 + $0x190] sm:$0xff] }
 0x782   :  { %v731_v32 = vmul.f32 %v720_v39, %v699_v45  ;;  %v124_v45 = vld [vmem:[#allocation2 + $0x238] sm:$0xff] }
 0x783   :  { %v724_v44 = vmul.f32 0.5, %v723_v41  ;;  %856 = vmatpush.msra.mxu3 %v124_v45 }
 0x784   :  { %v733_v46 = vmul.f32 %v731_v32, %v137_v40 }
 0x785   :  { %v725_v47 = vsub.f32 1.5, %v724_v44 }
 0x786   :  { %v1234_v48 = vadd.f32 %v733_v46, %v138_v43 }
 0x787   :  { %v726_v50 = vmul.f32 %v982_v36, %v725_v47 }
 0x788   :  { %753 = vmatmul.f32.vlgmr.msra.gmra.mxu2 %v1234_v48 }
 0x789   :  { %v730_v51 = vsel %vm729_vm1, %v982_v36, %v726_v50 }
 0x78a   :  { %v732_v53 = vmul.f32 %v730_v51, %v1224_v1  ;;  %v123_v1 = vld [vmem:[#allocation2 + $0x220] sm:$0xff] }
 0x78b   :  { %857 = vmatpush.msra.mxu3 %v123_v1 }
 0x78c   :  { %v734_v54 = vmul.f32 %v732_v53, %v137_v40 }
 0x78d   :  { %858 = vmatpush.msra.mxu3 %v122_v62 }
 0x78e   :  { %v1238_v55 = vadd.f32 %v734_v54, %v138_v43 }
 0x78f   :  { %859 = vmatpush.msra.mxu3 %v121_v17 }
 0x790   :  { %756 = vmatmul.f32.gmra.mxu2 %v1238_v55 }
 0x791   :  { %860 = vmatpush.msra.mxu3 %v120_v20 }
 0x793   :  { %861 = vmatpush.msra.mxu3 %v119_v23 }
 0x795   :  { %862 = vmatpush.msra.mxu3 %v118_v28 }
 0x797   :  { %863 = vmatpush.msra.mxu3 %v117_v15 }
 0x80b   :  { %v754_v60 = vpop.f32.mrf.mxu2 }
 0x80c   :  { %v1244_v2 = vadd.f32 %v754_v60, %v135_v4 }
 0x80e   :  { %v1247_v3 = vmul.f32 0.70710677, %v1244_v2 }
 0x810   :  { %v764_v42 = vmul.f32 %v1247_v3, %v1247_v3 }
 0x812   :  { %v765_v10 = vmin.f32 %v764_v42, 16.0 }
 0x813   :  { %v757_v59 = vpop.f32.mrf.mxu2 }
 0x814   :  { %v766_v12 = vmul.f32 2.1237322e-06, %v765_v10  ;;  %v777_v8 = vmul.f32 3.8918573e-05, %v765_v10  ;;  %v1251_v49 = vadd.f32 %v757_v59, %v135_v4 }
 0x816   :  { %v767_v13 = vadd.f32 0.00028619796, %v766_v12  ;;  %v778_v14 = vadd.f32 0.001143296, %v777_v8  ;;  %v1254_v52 = vmul.f32 0.70710677, %v1251_v49 }
 0x818   :  { %v768_v5 = vmul.f32 %v767_v13, %v765_v10  ;;  %v779_v30 = vmul.f32 %v778_v14, %v765_v10  ;;  %v804_v16 = vmul.f32 %v1254_v52, %v1254_v52 }
 0x81a   :  { %v780_v11 = vadd.f32 0.014752088, %v779_v30  ;;  %v769_v18 = vadd.f32 0.0036580483, %v768_v5  ;;  %v805_v19 = vmin.f32 %v804_v16, 16.0 }
 0x81c   :  { %v781_v21 = vmul.f32 %v780_v11, %v765_v10  ;;  %v806_v22 = vmul.f32 2.1237322e-06, %v805_v19  ;;  %v817_v24 = vmul.f32 3.8918573e-05, %v805_v19  ;;  %v770_v26 = vmul.f32 %v769_v18, %v765_v10 }
 0x81d   :  { %v760_v18 = vmul.f32 0.5, %v1244_v2  ;;  %v136_v2 = vld [vmem:[%s1284_s3 + $0x3] ss:$0 sm:$0xff] }
 0x81e   :  { %v782_v25 = vadd.f32 0.112945676, %v781_v21  ;;  %v807_v27 = vadd.f32 0.00028619796, %v806_v22  ;;  %v818_v29 = vadd.f32 0.001143296, %v817_v24 }
 0x81f   :  { %v771_v36 = vadd.f32 0.05243302, %v770_v26 }
 0x820   :  { %v783_v31 = vmul.f32 %v782_v25, %v765_v10  ;;  %v808_v33 = vmul.f32 %v807_v27, %v805_v19  ;;  %v819_v34 = vmul.f32 %v818_v29, %v805_v19  ;;  %v761_v27 = vmul.f32 0.5, %v1251_v49 }
 0x821   :  { %v772_v41 = vmul.f32 %v771_v36, %v765_v10 }
 0x822   :  { %v784_v35 = vadd.f32 0.4994258, %v783_v31  ;;  %v820_v37 = vadd.f32 0.014752088, %v819_v34  ;;  %v809_v39 = vadd.f32 0.0036580483, %v808_v33 }
 0x823   :  { %v773_v47 = vadd.f32 0.18741608, %v772_v41 }
 0x824   :  { %v785_v38 = vmul.f32 %v784_v35, %v765_v10  ;;  %v821_v40 = vmul.f32 %v820_v37, %v805_v19  ;;  %v810_v44 = vmul.f32 %v809_v39, %v805_v19 }
 0x825   :  { %v774_v61 = vmul.f32 %v773_v47, %v765_v10 }
 0x826   :  { %v786_v32 = vadd.f32 1.0, %v785_v38  ;;  %v822_v43 = vadd.f32 0.112945676, %v821_v40  ;;  %v811_v51 = vadd.f32 0.05243302, %v810_v44 }
 0x827   :  { %v775_v58 = vadd.f32 1.1283791, %v774_v61 }
 0x828   :  { %983 = vrcp.f32 %v786_v32  ;;  %v823_v46 = vmul.f32 %v822_v43, %v805_v19  ;;  %v812_v4 = vmul.f32 %v811_v51, %v805_v19  ;;  %v798_v60 = vand.u32 2147483648, %v786_v32 }
 0x829   :  { %v796_v7 = vand.u32 2147483647, %v786_v32  ;;  %vm792_vm3 = vweird.f32 %v786_v32  ;;  %v776_v8 = vmul.f32 %v775_v58, %v1247_v3 }
 0x82a   :  { %v824_v50 = vadd.f32 0.4994258, %v823_v46  ;;  %v813_v42 = vadd.f32 0.18741608, %v812_v4  ;;  %v799_v45 = vor.u32 1.1754944e-38, %v798_v60 }
 0x82b   :  { %vm797_vm7 = vcmp.eq.f32.partialorder %v796_v7, 8.507059e+37  ;;  %v139_v60 = vld [vmem:[%s1284_s3 + $0x6] ss:$0 sm:$0xff] }
 0x82c   :  { %v825_v53 = vmul.f32 %v824_v50, %v805_v19  ;;  %v814_v1 = vmul.f32 %v813_v42, %v805_v19  ;;  %v140_v42 = vld [vmem:[%s1284_s3 + $0x7] ss:$0 sm:$0xff] }
 0x82e   :  { %v984_v54 = vpop.eup %983  ;;  %v826_v63 = vadd.f32 1.0, %v825_v53  ;;  %v815_v16 = vadd.f32 1.1283791, %v814_v1 }
 0x82f   :  { %v788_v56 = vmul.f32 %v984_v54, %v786_v32  ;;  %vm793_vm2 = vweird.f32 %v984_v54 }
 0x830   :  { %985 = vrcp.f32 %v826_v63  ;;  %vm794_vm5 = vmor %vm792_vm3, %vm793_vm2  ;;  %v838_v30 = vand.u32 2147483648, %v826_v63  ;;  %v836_v11 = vand.u32 2147483647, %v826_v63  ;;  %vm832_vm9 = vweird.f32 %v826_v63 }
 0x831   :  { %v789_v57 = vsub.f32 1.0, %v788_v56  ;;  %v816_v23 = vmul.f32 %v815_v16, %v1254_v52 }
 0x832   :  { %v839_v3 = vor.u32 1.1754944e-38, %v838_v30  ;;  %vm837_vm11 = vcmp.eq.f32.partialorder %v836_v11, 8.507059e+37 }
 0x833   :  { %v790_v0 = vmul.f32 %v984_v54, %v789_v57 }
 0x835   :  { %v791_v6 = vadd.f32 %v984_v54, %v790_v0 }
 0x836   :  { %v986_v12 = vpop.eup %985 }
 0x837   :  { %v795_v59 = vsel %vm794_vm5, %v984_v54, %v791_v6  ;;  %v828_v13 = vmul.f32 %v986_v12, %v826_v63  ;;  %vm833_vm8 = vweird.f32 %v986_v12 }
 0x838   :  { %v800_v10 = vsel %vm797_vm7, %v799_v45, %v795_v59  ;;  %vm834_vm10 = vmor %vm832_vm9, %vm833_vm8 }
 0x839   :  { %v801_v14 = vmul.f32 %v800_v10, %v776_v8  ;;  %v829_v62 = vsub.f32 1.0, %v828_v13 }
 0x83b   :  { %v939_v5 = vclamps-f32 %v801_v14, 1.0  ;;  %v830_v17 = vmul.f32 %v986_v12, %v829_v62 }
 0x83d   :  { %v844_v20 = vadd.f32 1.0, %v939_v5  ;;  %v831_v21 = vadd.f32 %v986_v12, %v830_v17 }
 0x83f   :  { %v846_v22 = vmul.f32 %v844_v20, %v760_v18  ;;  %v835_v19 = vsel %vm834_vm10, %v986_v12, %v831_v21 }
 0x840   :  { %v840_v24 = vsel %vm837_vm11, %v839_v3, %v835_v19 }
 0x841   :  { %864 = vmatmul.f32.vlgmr.msra.gmra.mxu3 %v846_v22  ;;  %v841_v25 = vmul.f32 %v840_v24, %v816_v23 }
 0x843   :  { %v940_v26 = vclamps-f32 %v841_v25, 1.0 }
 0x845   :  { %v845_v28 = vadd.f32 1.0, %v940_v26 }
 0x847   :  { %v847_v15 = vmul.f32 %v845_v28, %v761_v27 }
 0x849   :  { %867 = vmatmul.f32.gmra.mxu3 %v847_v15 }
 0x8c4   :  { %v865_v29 = vpop.f32.mrf.mxu3 }
 0x8c5   :  { %v866_v31 = vadd.f32 %v865_v29, %v136_v2 }
 0x8c7   :  { %v871_v33 = vadd.f32 %v866_v31, %v1234_v48 }
 0x8c9   :  { %873 = vadd.xlane.f32.xlu2 %v871_v33 }
 0x8cc   :  { %v868_v52 = vpop.f32.mrf.mxu3 }
 0x8cd   :  { %v869_v34 = vadd.f32 %v868_v52, %v136_v2 }
 0x8cf   :  { %v872_v35 = vadd.f32 %v869_v34, %v1238_v55 }
 0x8d1   :  { %875 = vadd.xlane.f32.xlu0 %v872_v35 }
 0x93c   :  { %v874_v36 = vpop.xlane.xlu2 %873 }
 0x93d   :  { %v877_v37 = vmul.f32 0.03125, %v874_v36 }
 0x93f   :  { %v879_v49 = vsub.f32 %v871_v33, %v877_v37 }
 0x941   :  { %v881_v38 = vmul.f32 %v1220_v9, %v879_v49 }
 0x943   :  { %v883_v39 = vmul.f32 %v881_v38, %v881_v38 }
 0x944   :  { %v876_v40 = vpop.xlane.xlu0 %875 }
 0x945   :  { %885 = vadd.xlane.f32.xlu1 %v883_v39  ;;  %v878_v32 = vmul.f32 0.03125, %v876_v40 }
 0x947   :  { %v880_v41 = vsub.f32 %v872_v35, %v878_v32 }
 0x949   :  { %v882_v43 = vmul.f32 %v1220_v9, %v880_v41 }
 0x94b   :  { %v884_v44 = vmul.f32 %v882_v43, %v882_v43 }
 0x94d   :  { %887 = vadd.xlane.f32.xlu2 %v884_v44 }
 0x9b8   :  { %v886_v48 = vpop.xlane.xlu1 %885 }
 0x9b9   :  { %v889_v46 = vmul.f32 0.03125, %v886_v48 }
 0x9bb   :  { %v891_v47 = vadd.f32 1e-05, %v889_v46 }
 0x9bd   :  { %987 = vrsqrt.f32 %v891_v47  ;;  %vm899_vm13 = vweird.f32 %v891_v47 }
 0x9c0   :  { %v888_v55 = vpop.xlane.xlu2 %887 }
 0x9c1   :  { %v890_v50 = vmul.f32 0.03125, %v888_v55 }
 0x9c3   :  { %v988_v51 = vpop.eup %987  ;;  %v892_v54 = vadd.f32 1e-05, %v890_v50 }
 0x9c4   :  { %v894_v53 = vmul.f32 %v988_v51, %v891_v47  ;;  %vm900_vm12 = vweird.f32 %v988_v51 }
 0x9c5   :  { %989 = vrsqrt.f32 %v892_v54  ;;  %vm901_vm4 = vmor %vm899_vm13, %vm900_vm12  ;;  %vm909_vm14 = vweird.f32 %v892_v54 }
 0x9c6   :  { %v895_v61 = vmul.f32 %v988_v51, %v894_v53 }
 0x9c8   :  { %v896_v56 = vmul.f32 0.5, %v895_v61 }
 0x9ca   :  { %v897_v63 = vsub.f32 1.5, %v896_v56 }
 0x9cb   :  { %v990_v4 = vpop.eup %989 }
 0x9cc   :  { %v898_v57 = vmul.f32 %v988_v51, %v897_v63  ;;  %v904_v9 = vmul.f32 %v990_v4, %v892_v54  ;;  %vm910_vm6 = vweird.f32 %v990_v4 }
 0x9cd   :  { %vm911_vm15 = vmor %vm909_vm14, %vm910_vm6 }
 0x9ce   :  { %v902_v58 = vsel %vm901_vm4, %v988_v51, %v898_v57  ;;  %v905_v7 = vmul.f32 %v990_v4, %v904_v9 }
 0x9cf   :  { %v913_v0 = vmul.f32 %v902_v58, %v881_v38 }
 0x9d0   :  { %v906_v45 = vmul.f32 0.5, %v905_v7 }
 0x9d1   :  { %v915_v6 = vmul.f32 %v913_v0, %v139_v60 }
 0x9d2   :  { %v907_v8 = vsub.f32 1.5, %v906_v45 }
 0x9d3   :  { %v917_v12 = vadd.f32 %v915_v6, %v140_v42 }
 0x9d4   :  { %v908_v59 = vmul.f32 %v990_v4, %v907_v8 }
 0x9d5   :  { %919 = vst [vmem:[%s1285_s4] sm:$0xff] %v917_v12 }
 0x9d6   :  { %v912_v10 = vsel %vm911_vm15, %v990_v4, %v908_v59 }
 0x9d7   :  { %v914_v1 = vmul.f32 %v912_v10, %v882_v43 }
 0x9d9   :  { %v916_v13 = vmul.f32 %v914_v1, %v139_v60 }
 0x9db   :  { %v918_v14 = vadd.f32 %v916_v13, %v140_v42 }
 0x9dd   :  { %920 = vst [vmem:[%s1285_s4 + $0x8] sm:$0xff] %v918_v14 }
 0x9de   :  { %925 = vsyncpa [#allocation3], 1 }

</bundles_post_ra>
